<compile_context>
chip_gen: v5e
topology: v5e:2x2
jax: 0.10.0
libtpu: 0.0.40
codegen_flags: <defaults>
</compile_context>

<pallas_src>
import functools
import math

import numpy as np
import jax
import jax.numpy as jnp
from jax.experimental import pallas as pl
from jax.experimental.pallas import tpu as pltpu


# ----------------------------------------------------------------------------
# In-kernel helpers (element-wise math stays in f32)
# ----------------------------------------------------------------------------
def _layernorm(x, g, b, eps):
    mu = jnp.mean(x, axis=-1, keepdims=True)
    xc = x - mu
    var = jnp.mean(xc * xc, axis=-1, keepdims=True)
    return xc * jax.lax.rsqrt(var + eps) * g + b


def _gelu_tanh(x):
    # TODO(synk): exact erf-based nn.GELU has no guaranteed Mosaic lowering;
    # the tanh approximation (single EUP tanh, |err| < ~1e-3) is used instead.
    c = math.sqrt(2.0 / math.pi)
    return 0.5 * x * (1.0 + jnp.tanh(c * (x + 0.044715 * x * x * x)))


def _conv_validity_masks(h, w):
    # masks[p, t] = 1 iff tap t = kh*3+kw of a SAME 3x3 conv at output position
    # p = i*w + j reads a real pixel (not zero padding).  Tiny constant array.
    m = np.zeros((h * w, 9), np.float32)
    for t in range(9):
        di, dj = t // 3 - 1, t % 3 - 1
        for i in range(h):
            for j in range(w):
                if 0 <= i + di < h and 0 <= j + dj < w:
                    m[i * w + j, t] = 1.0
    return jnp.asarray(m)


# ----------------------------------------------------------------------------
# Fused kernel: Block (attn + MLP) -> cam_norm -> 3x3 conv head -> GAP
# ----------------------------------------------------------------------------
def cam6_fused_kernel(x_ref, n1g, n1b, wqkv, wproj, bproj, n2g, n2b,
                      w1, b1, w2, b2, cng, cnb, mask_ref, w9_ref, cb_ref,
                      map_ref, logit_ref,
                      *, num_heads, head_dim, seq_valid, hw, width):
    f32 = jnp.float32
    bf16 = jnp.bfloat16
    x = x_ref[0].astype(f32)                              # (Sp, D) tokens-major
    sp, d = x.shape
    scale = head_dim ** -0.5

    # --- attention: norm1 -> qkv -> per-head softmax(QK^T)V -> single proj ---
    xn = _layernorm(x, n1g[...], n1b[...], 1e-5)          # nn.LayerNorm default
    qkv = jnp.dot(xn.astype(bf16), wqkv[...],
                  preferred_element_type=f32)             # (Sp, 3D), f32 acc
    # Fold the attention scale into Q once: S*D f32 muls instead of S*S*H.
    q_all = (qkv[:, :d] * scale).astype(bf16)
    k_all = qkv[:, d:2 * d].astype(bf16)
    v_all = qkv[:, 2 * d:3 * d].astype(bf16)

    key_ok = None
    if seq_valid < sp:                                    # mask padded key cols
        key_ok = jax.lax.broadcasted_iota(jnp.int32, (sp, sp), 1) < seq_valid

    heads = []
    for h in range(num_heads):
        lo = h * head_dim
        q = q_all[:, lo:lo + head_dim]
        k = k_all[:, lo:lo + head_dim]
        v = v_all[:, lo:lo + head_dim]
        s = jax.lax.dot_general(q, k, (((1,), (1,)), ((), ())),
                                preferred_element_type=f32)           # (Sp, Sp)
        if key_ok is not None:
            s = jnp.where(key_ok, s, -1e30)
        s = s - jnp.max(s, axis=-1, keepdims=True)
        p = jnp.exp(s)
        p = p * pl.reciprocal(jnp.sum(p, axis=-1, keepdims=True), approx=True)
        heads.append(jnp.dot(p.astype(bf16), v, preferred_element_type=f32))
    o = jnp.concatenate(heads, axis=-1)                   # (Sp, D)
    x1 = x + jnp.dot(o.astype(bf16), wproj[...],          # single full proj
                     preferred_element_type=f32) + bproj[...]

    # --- MLP: norm2 -> fc1 -> GELU(tanh) -> fc2, residual ---
    xn2 = _layernorm(x1, n2g[...], n2b[...], 1e-5)
    h1 = jnp.dot(xn2.astype(bf16), w1[...], preferred_element_type=f32) + b1[...]
    h1 = _gelu_tanh(h1)
    h2 = jnp.dot(h1.astype(bf16), w2[...], preferred_element_type=f32) + b2[...]
    x2 = x1 + h2

    # --- cam_norm (eps = 1e-6) ---
    camn = _layernorm(x2, cng[...], cnb[...], 1e-6)

    # --- fused 3x3 SAME conv head (in-kernel im2col) + global average pool ---
    feat = camn[1:1 + hw, :]                              # drop cls -> (HW, D)
    cols = []
    for t in range(9):
        di, dj = t // 3 - 1, t % 3 - 1
        off = (di * width + dj) % hw                      # static row rotation
        shifted = feat if off == 0 else jnp.concatenate(
            [feat[off:, :], feat[:off, :]], axis=0)
        cols.append((shifted * mask_ref[:, t:t + 1]).astype(bf16))
    pat = jnp.concatenate(cols, axis=-1)                  # (HW, 9D)
    acc = jnp.dot(pat, w9_ref[...], preferred_element_type=f32) + cb_ref[...]
    map_ref[0] = acc.astype(map_ref.dtype)                # lane-dense (HW, Cp)
    # AdaptiveAvgPool2d(1) == mean over spatial positions
    logit_ref[0] = (jnp.sum(acc, axis=0, keepdims=True) * (1.0 / hw)
                    ).astype(logit_ref.dtype)


# ----------------------------------------------------------------------------
# Wrapper: padding, bf16 weight casts, BlockSpecs, NCHW layout glue
# ----------------------------------------------------------------------------
def cam6_fuse_block(x, params, num_heads, num_classes):
    B, S, D = x.shape
    hs = int(round((S - 1) ** 0.5))
    hw = hs * hs
    hd = D // num_heads
    sp = ((S + 7) // 8) * 8                               # sublane-pad tokens
    cp = ((num_classes + 127) // 128) * 128               # lane-pad conv Cout
    xp = jnp.pad(x, ((0, 0), (0, sp - S), (0, 0))) if sp != S else x

    (n1g, n1b, wqkv, wproj, bproj, n2g, n2b,
     w1, b1, w2, b2, cng, cnb) = params["block"]
    hidden = w1.shape[1]
    to_bf16 = lambda a: a.astype(jnp.bfloat16)
    w9 = params["conv_w"].reshape(9 * D, num_classes)
    w9 = to_bf16(jnp.pad(w9, ((0, 0), (0, cp - num_classes))))
    cb = jnp.pad(params["conv_b"], ((0, 0), (0, cp - num_classes)))
    masks = _conv_validity_masks(hs, hs)

    def full(shape):
        return pl.BlockSpec(shape, lambda b: (0,) * len(shape))

    kernel = functools.partial(cam6_fused_kernel, num_heads=num_heads,
                               head_dim=hd, seq_valid=S, hw=hw, width=hs)
    cam_map, logits = pl.pallas_call(
        kernel,
        out_shape=(jax.ShapeDtypeStruct((B, hw, cp), x.dtype),
                   jax.ShapeDtypeStruct((B, 1, cp), x.dtype)),
        grid=(B,),
        in_specs=[
            pl.BlockSpec((1, sp, D), lambda b: (b, 0, 0)),  # x (padded)
            full((1, D)), full((1, D)),                     # norm1 gamma, beta
            full((D, 3 * D)),                               # qkv weight (bf16)
            full((D, D)), full((1, D)),                     # proj w (bf16), b
            full((1, D)), full((1, D)),                     # norm2 gamma, beta
            full((D, hidden)), full((1, hidden)),           # fc1 w (bf16), b
            full((hidden, D)), full((1, D)),                # fc2 w (bf16), b
            full((1, D)), full((1, D)),                     # cam_norm gamma, beta
            full((hw, 9)),                                  # conv validity masks
            full((9 * D, cp)),                              # conv weight (bf16)
            full((1, cp)),                                  # conv bias (padded)
        ],
        out_specs=(pl.BlockSpec((1, hw, cp), lambda b: (b, 0, 0)),
                   pl.BlockSpec((1, 1, cp), lambda b: (b, 0, 0))),
        compiler_params=pltpu.CompilerParams(
            dimension_semantics=("parallel",),
            vmem_limit_bytes=64 * 1024 * 1024),
    )(xp, n1g, n1b, to_bf16(wqkv), to_bf16(wproj), bproj, n2g, n2b,
      to_bf16(w1), b1, to_bf16(w2), b2, cng, cnb, masks, w9, cb)

    cam_map = cam_map[:, :, :num_classes]
    logits = logits[:, :, :num_classes]
    cam_x = cam_map.reshape(B, hs, hs, num_classes).transpose(0, 3, 1, 2)  # NCHW
    return logits.reshape(B, num_classes), cam_x


# ----------------------------------------------------------------------------
# Deterministic parameter init (synthetic weights, f32 master copies)
# ----------------------------------------------------------------------------
def init_params(key, D, num_classes, mlp_ratio=4.0):
    hidden = int(D * mlp_ratio)
    ks = jax.random.split(key, 10)
    w = lambda k, s, sc=0.02: jax.random.normal(k, s, jnp.float32) * sc
    ones = lambda s: jnp.ones(s, jnp.float32)
    block = (
        ones((1, D)), w(ks[0], (1, D)),                      # norm1 gamma, beta
        w(ks[1], (D, 3 * D)),                                # qkv (qkv_bias=False)
        w(ks[2], (D, D)), w(ks[3], (1, D)),                  # proj w, b
        ones((1, D)), w(ks[4], (1, D)),                      # norm2 gamma, beta
        w(ks[5], (D, hidden)), w(ks[6], (1, hidden)),        # fc1 w, b
        w(ks[7], (hidden, D)), w(ks[8], (1, D)),             # fc2 w, b
        ones((1, D)), jnp.zeros((1, D), jnp.float32),        # cam_norm gamma, beta
    )
    conv_w = w(ks[9], (9, D, num_classes), 0.05)             # (kh*3+kw, Cin, Cout)
    conv_b = jnp.zeros((1, num_classes), jnp.float32)
    return {"block": block, "conv_w": conv_w, "conv_b": conv_b}


# ----------------------------------------------------------------------------
# Pure-JAX f32 reference (exact semantics) for validation
# ----------------------------------------------------------------------------
def reference_forward(x, params, num_heads, num_classes):
    B, S, D = x.shape
    hd = D // num_heads
    (n1g, n1b, wqkv, wproj, bproj, n2g, n2b,
     w1, b1, w2, b2, cng, cnb) = params["block"]

    def ln(t, g, b, eps):
        mu = t.mean(-1, keepdims=True)
        v = ((t - mu) ** 2).mean(-1, keepdims=True)
        return (t - mu) / jnp.sqrt(v + eps) * g + b

    xn = ln(x, n1g, n1b, 1e-5)
    qkv = (xn @ wqkv).reshape(B, S, 3, num_heads, hd).transpose(2, 0, 3, 1, 4)
    q, k, v = qkv[0], qkv[1], qkv[2]
    attn = jax.nn.softmax((q @ jnp.swapaxes(k, -1, -2)) * (hd ** -0.5), axis=-1)
    o = (attn @ v).transpose(0, 2, 1, 3).reshape(B, S, D)
    x1 = x + o @ wproj + bproj
    xn2 = ln(x1, n2g, n2b, 1e-5)
    h1 = jax.nn.gelu(xn2 @ w1 + b1, approximate=False)
    x2 = x1 + h1 @ w2 + b2
    camn = ln(x2, cng, cnb, 1e-6)

    hs = int(round((S - 1) ** 0.5))
    feat = camn[:, 1:].reshape(B, hs, hs, D)
    wconv = params["conv_w"].reshape(3, 3, D, num_classes)
    cam = jax.lax.conv_general_dilated(
        feat, wconv, (1, 1), "SAME",
        dimension_numbers=("NHWC", "HWIO", "NHWC"))
    cam = cam + params["conv_b"].reshape(1, 1, 1, num_classes)
    logits = cam.mean(axis=(1, 2))
    return logits, cam.transpose(0, 3, 1, 2)


# ----------------------------------------------------------------------------
if __name__ == "__main__":
    B, D, num_heads, num_classes = 2, 32, 4, 8
    hs = 4
    S = 1 + hs * hs  # cls token + 4x4 patch grid

    key = jax.random.PRNGKey(0)
    kx, kp = jax.random.split(key)
    x = jax.random.normal(kx, (B, S, D), jnp.float32)
    params = init_params(kp, D, num_classes)

    logits, cam_x = jax.block_until_ready(
        cam6_fuse_block(x, params, num_heads, num_classes))

    assert logits.shape == (B, num_classes)
    assert cam_x.shape == (B, num_classes, hs, hs)

    ref_logits, ref_cam = reference_forward(x, params, num_heads, num_classes)
    err = max(float(jnp.max(jnp.abs(logits - ref_logits))),
              float(jnp.max(jnp.abs(cam_x - ref_cam))))
    assert err < 5e-2, f"mismatch vs reference: {err}"

    print("KERNEL_OK")
</pallas_src>

<mosaic_0001>
module attributes {stable_mosaic.version = 11 : i64} {
  func.func @cam6_fused_kernel(%arg0: i32, %arg1: memref<1x24x32xf32, #tpu.memory_space<vmem>>, %arg2: memref<1x32xf32, #tpu.memory_space<vmem>>, %arg3: memref<1x32xf32, #tpu.memory_space<vmem>>, %arg4: memref<32x96xbf16, #tpu.memory_space<vmem>>, %arg5: memref<32x32xbf16, #tpu.memory_space<vmem>>, %arg6: memref<1x32xf32, #tpu.memory_space<vmem>>, %arg7: memref<1x32xf32, #tpu.memory_space<vmem>>, %arg8: memref<1x32xf32, #tpu.memory_space<vmem>>, %arg9: memref<32x128xbf16, #tpu.memory_space<vmem>>, %arg10: memref<1x128xf32, #tpu.memory_space<vmem>>, %arg11: memref<128x32xbf16, #tpu.memory_space<vmem>>, %arg12: memref<1x32xf32, #tpu.memory_space<vmem>>, %arg13: memref<1x32xf32, #tpu.memory_space<vmem>>, %arg14: memref<1x32xf32, #tpu.memory_space<vmem>>, %arg15: memref<16x9xf32, #tpu.memory_space<vmem>>, %arg16: memref<288x128xbf16, #tpu.memory_space<vmem>>, %arg17: memref<1x128xf32, #tpu.memory_space<vmem>>, %arg18: memref<1x16x128xf32, #tpu.memory_space<vmem>>, %arg19: memref<1x1x128xf32, #tpu.memory_space<vmem>>) attributes {dimension_semantics = [#tpu.dimension_semantics<parallel>], iteration_bounds = array<i64: 2>, scalar_prefetch = 0 : i64, scratch_operands = 0 : i64, tpu.core_type = #tpu.core_type<tc>, window_params = [{transform_indices = @transform_0, window_bounds = array<i64: 1, 24, 32>}, {pipeline_mode = #tpu.pipeline_mode<synchronous>, transform_indices = @transform_1, window_bounds = array<i64: 1, 32>}, {pipeline_mode = #tpu.pipeline_mode<synchronous>, transform_indices = @transform_2, window_bounds = array<i64: 1, 32>}, {pipeline_mode = #tpu.pipeline_mode<synchronous>, transform_indices = @transform_3, window_bounds = array<i64: 32, 96>}, {pipeline_mode = #tpu.pipeline_mode<synchronous>, transform_indices = @transform_4, window_bounds = array<i64: 32, 32>}, {pipeline_mode = #tpu.pipeline_mode<synchronous>, transform_indices = @transform_5, window_bounds = array<i64: 1, 32>}, {pipeline_mode = #tpu.pipeline_mode<synchronous>, transform_indices = @transform_6, window_bounds = array<i64: 1, 32>}, {pipeline_mode = #tpu.pipeline_mode<synchronous>, transform_indices = @transform_7, window_bounds = array<i64: 1, 32>}, {pipeline_mode = #tpu.pipeline_mode<synchronous>, transform_indices = @transform_8, window_bounds = array<i64: 32, 128>}, {pipeline_mode = #tpu.pipeline_mode<synchronous>, transform_indices = @transform_9, window_bounds = array<i64: 1, 128>}, {pipeline_mode = #tpu.pipeline_mode<synchronous>, transform_indices = @transform_10, window_bounds = array<i64: 128, 32>}, {pipeline_mode = #tpu.pipeline_mode<synchronous>, transform_indices = @transform_11, window_bounds = array<i64: 1, 32>}, {pipeline_mode = #tpu.pipeline_mode<synchronous>, transform_indices = @transform_12, window_bounds = array<i64: 1, 32>}, {pipeline_mode = #tpu.pipeline_mode<synchronous>, transform_indices = @transform_13, window_bounds = array<i64: 1, 32>}, {pipeline_mode = #tpu.pipeline_mode<synchronous>, transform_indices = @transform_14, window_bounds = array<i64: 16, 9>}, {pipeline_mode = #tpu.pipeline_mode<synchronous>, transform_indices = @transform_15, window_bounds = array<i64: 288, 128>}, {pipeline_mode = #tpu.pipeline_mode<synchronous>, transform_indices = @transform_16, window_bounds = array<i64: 1, 128>}, {transform_indices = @transform_17, window_bounds = array<i64: 1, 16, 128>}, {transform_indices = @transform_18, window_bounds = array<i64: 1, 1, 128>}]} {
    %c0 = arith.constant 0 : index
    %c0_0 = arith.constant 0 : index
    %c0_1 = arith.constant 0 : index
    %0 = vector.load %arg1[%c0, %c0_0, %c0_1] : memref<1x24x32xf32, #tpu.memory_space<vmem>>, vector<1x24x32xf32>
    %1 = vector.shape_cast %0 : vector<1x24x32xf32> to vector<24x32xf32>
    %c0_2 = arith.constant 0 : index
    %c0_3 = arith.constant 0 : index
    %2 = vector.load %arg2[%c0_2, %c0_3] : memref<1x32xf32, #tpu.memory_space<vmem>>, vector<1x32xf32>
    %c0_4 = arith.constant 0 : index
    %c0_5 = arith.constant 0 : index
    %3 = vector.load %arg3[%c0_4, %c0_5] : memref<1x32xf32, #tpu.memory_space<vmem>>, vector<1x32xf32>
    %cst = arith.constant dense<0.000000e+00> : vector<24xf32>
    %4 = vector.multi_reduction <add>, %1, %cst [1] : vector<24x32xf32> to vector<24xf32>
    %5 = vector.shape_cast %4 : vector<24xf32> to vector<24x1xf32>
    %cst_6 = arith.constant 3.200000e+01 : f32
    %6 = vector.broadcast %cst_6 : f32 to vector<24x1xf32>
    %7 = arith.divf %5, %6 : vector<24x1xf32>
    %8 = vector.broadcast %7 : vector<24x1xf32> to vector<24x32xf32>
    %9 = arith.subf %1, %8 : vector<24x32xf32>
    %10 = arith.mulf %9, %9 : vector<24x32xf32>
    %cst_7 = arith.constant dense<0.000000e+00> : vector<24xf32>
    %11 = vector.multi_reduction <add>, %10, %cst_7 [1] : vector<24x32xf32> to vector<24xf32>
    %12 = vector.shape_cast %11 : vector<24xf32> to vector<24x1xf32>
    %cst_8 = arith.constant 3.200000e+01 : f32
    %13 = vector.broadcast %cst_8 : f32 to vector<24x1xf32>
    %14 = arith.divf %12, %13 : vector<24x1xf32>
    %cst_9 = arith.constant 9.99999974E-6 : f32
    %15 = vector.broadcast %cst_9 : f32 to vector<24x1xf32>
    %16 = arith.addf %14, %15 : vector<24x1xf32>
    %17 = math.rsqrt %16 : vector<24x1xf32>
    %18 = vector.broadcast %17 : vector<24x1xf32> to vector<24x32xf32>
    %19 = arith.mulf %9, %18 : vector<24x32xf32>
    %20 = vector.broadcast %2 : vector<1x32xf32> to vector<24x32xf32>
    %21 = arith.mulf %19, %20 : vector<24x32xf32>
    %22 = vector.broadcast %3 : vector<1x32xf32> to vector<24x32xf32>
    %23 = arith.addf %21, %22 : vector<24x32xf32>
    %24 = arith.truncf %23 : vector<24x32xf32> to vector<24x32xbf16>
    %c0_10 = arith.constant 0 : index
    %c0_11 = arith.constant 0 : index
    %25 = vector.load %arg4[%c0_10, %c0_11] : memref<32x96xbf16, #tpu.memory_space<vmem>>, vector<32x96xbf16>
    %cst_12 = arith.constant dense<0.000000e+00> : vector<24x96xf32>
    %26 = tpu.matmul %24, %25, %cst_12 {dimension_numbers = #tpu.dot_dimension_numbers<[1], [0], [0], [1], [0, 0, 1, 1], [], []>} : vector<24x32xbf16>, vector<32x96xbf16>, vector<24x96xf32> -> vector<24x96xf32>
    %27 = vector.extract_strided_slice %26 {offsets = [0, 0], sizes = [24, 32], strides = [1, 1]} : vector<24x96xf32> to vector<24x32xf32>
    %cst_13 = arith.constant 0.353553385 : f32
    %28 = vector.broadcast %cst_13 : f32 to vector<24x32xf32>
    %29 = arith.mulf %27, %28 : vector<24x32xf32>
    %30 = arith.truncf %29 : vector<24x32xf32> to vector<24x32xbf16>
    %31 = vector.extract_strided_slice %26 {offsets = [0, 32], sizes = [24, 32], strides = [1, 1]} : vector<24x96xf32> to vector<24x32xf32>
    %32 = arith.truncf %31 : vector<24x32xf32> to vector<24x32xbf16>
    %33 = vector.extract_strided_slice %26 {offsets = [0, 64], sizes = [24, 32], strides = [1, 1]} : vector<24x96xf32> to vector<24x32xf32>
    %34 = arith.truncf %33 : vector<24x32xf32> to vector<24x32xbf16>
    %35 = tpu.iota {dimensions = array<i32: 1>} : vector<24x24xi32>
    %c17_i32 = arith.constant 17 : i32
    %36 = vector.broadcast %c17_i32 : i32 to vector<24x24xi32>
    %37 = arith.cmpi slt, %35, %36 : vector<24x24xi32>
    %38 = vector.extract_strided_slice %30 {offsets = [0, 0], sizes = [24, 8], strides = [1, 1]} : vector<24x32xbf16> to vector<24x8xbf16>
    %39 = vector.extract_strided_slice %32 {offsets = [0, 0], sizes = [24, 8], strides = [1, 1]} : vector<24x32xbf16> to vector<24x8xbf16>
    %40 = vector.extract_strided_slice %34 {offsets = [0, 0], sizes = [24, 8], strides = [1, 1]} : vector<24x32xbf16> to vector<24x8xbf16>
    %cst_14 = arith.constant dense<0.000000e+00> : vector<24x24xf32>
    %41 = tpu.matmul %38, %39, %cst_14 {dimension_numbers = #tpu.dot_dimension_numbers<[1], [1], [0], [0], [0, 0, 1, 0], [], []>} : vector<24x8xbf16>, vector<24x8xbf16>, vector<24x24xf32> -> vector<24x24xf32>
    %cst_15 = arith.constant -1.000000e+30 : f32
    %42 = vector.broadcast %cst_15 : f32 to vector<24x24xf32>
    %43 = arith.select %37, %41, %42 : vector<24x24xi1>, vector<24x24xf32>
    %cst_16 = arith.constant dense<0xFF800000> : vector<24xf32>
    %44 = vector.multi_reduction <maximumf>, %43, %cst_16 [1] : vector<24x24xf32> to vector<24xf32>
    %45 = vector.shape_cast %44 : vector<24xf32> to vector<24x1xf32>
    %46 = vector.broadcast %45 : vector<24x1xf32> to vector<24x24xf32>
    %47 = arith.subf %43, %46 : vector<24x24xf32>
    %48 = math.exp %47 : vector<24x24xf32>
    %cst_17 = arith.constant dense<0.000000e+00> : vector<24xf32>
    %49 = vector.multi_reduction <add>, %48, %cst_17 [1] : vector<24x24xf32> to vector<24xf32>
    %50 = vector.shape_cast %49 : vector<24xf32> to vector<24x1xf32>
    %51 = tpu.reciprocal %50 {approx = true} : vector<24x1xf32> -> vector<24x1xf32>
    %52 = vector.broadcast %51 : vector<24x1xf32> to vector<24x24xf32>
    %53 = arith.mulf %48, %52 : vector<24x24xf32>
    %54 = arith.truncf %53 : vector<24x24xf32> to vector<24x24xbf16>
    %cst_18 = arith.constant dense<0.000000e+00> : vector<24x8xf32>
    %55 = tpu.matmul %54, %40, %cst_18 {dimension_numbers = #tpu.dot_dimension_numbers<[1], [0], [0], [1], [0, 0, 1, 1], [], []>} : vector<24x24xbf16>, vector<24x8xbf16>, vector<24x8xf32> -> vector<24x8xf32>
    %56 = vector.extract_strided_slice %30 {offsets = [0, 8], sizes = [24, 8], strides = [1, 1]} : vector<24x32xbf16> to vector<24x8xbf16>
    %57 = vector.extract_strided_slice %32 {offsets = [0, 8], sizes = [24, 8], strides = [1, 1]} : vector<24x32xbf16> to vector<24x8xbf16>
    %58 = vector.extract_strided_slice %34 {offsets = [0, 8], sizes = [24, 8], strides = [1, 1]} : vector<24x32xbf16> to vector<24x8xbf16>
    %cst_19 = arith.constant dense<0.000000e+00> : vector<24x24xf32>
    %59 = tpu.matmul %56, %57, %cst_19 {dimension_numbers = #tpu.dot_dimension_numbers<[1], [1], [0], [0], [0, 0, 1, 0], [], []>} : vector<24x8xbf16>, vector<24x8xbf16>, vector<24x24xf32> -> vector<24x24xf32>
    %cst_20 = arith.constant -1.000000e+30 : f32
    %60 = vector.broadcast %cst_20 : f32 to vector<24x24xf32>
    %61 = arith.select %37, %59, %60 : vector<24x24xi1>, vector<24x24xf32>
    %cst_21 = arith.constant dense<0xFF800000> : vector<24xf32>
    %62 = vector.multi_reduction <maximumf>, %61, %cst_21 [1] : vector<24x24xf32> to vector<24xf32>
    %63 = vector.shape_cast %62 : vector<24xf32> to vector<24x1xf32>
    %64 = vector.broadcast %63 : vector<24x1xf32> to vector<24x24xf32>
    %65 = arith.subf %61, %64 : vector<24x24xf32>
    %66 = math.exp %65 : vector<24x24xf32>
    %cst_22 = arith.constant dense<0.000000e+00> : vector<24xf32>
    %67 = vector.multi_reduction <add>, %66, %cst_22 [1] : vector<24x24xf32> to vector<24xf32>
    %68 = vector.shape_cast %67 : vector<24xf32> to vector<24x1xf32>
    %69 = tpu.reciprocal %68 {approx = true} : vector<24x1xf32> -> vector<24x1xf32>
    %70 = vector.broadcast %69 : vector<24x1xf32> to vector<24x24xf32>
    %71 = arith.mulf %66, %70 : vector<24x24xf32>
    %72 = arith.truncf %71 : vector<24x24xf32> to vector<24x24xbf16>
    %cst_23 = arith.constant dense<0.000000e+00> : vector<24x8xf32>
    %73 = tpu.matmul %72, %58, %cst_23 {dimension_numbers = #tpu.dot_dimension_numbers<[1], [0], [0], [1], [0, 0, 1, 1], [], []>} : vector<24x24xbf16>, vector<24x8xbf16>, vector<24x8xf32> -> vector<24x8xf32>
    %74 = vector.extract_strided_slice %30 {offsets = [0, 16], sizes = [24, 8], strides = [1, 1]} : vector<24x32xbf16> to vector<24x8xbf16>
    %75 = vector.extract_strided_slice %32 {offsets = [0, 16], sizes = [24, 8], strides = [1, 1]} : vector<24x32xbf16> to vector<24x8xbf16>
    %76 = vector.extract_strided_slice %34 {offsets = [0, 16], sizes = [24, 8], strides = [1, 1]} : vector<24x32xbf16> to vector<24x8xbf16>
    %cst_24 = arith.constant dense<0.000000e+00> : vector<24x24xf32>
    %77 = tpu.matmul %74, %75, %cst_24 {dimension_numbers = #tpu.dot_dimension_numbers<[1], [1], [0], [0], [0, 0, 1, 0], [], []>} : vector<24x8xbf16>, vector<24x8xbf16>, vector<24x24xf32> -> vector<24x24xf32>
    %cst_25 = arith.constant -1.000000e+30 : f32
    %78 = vector.broadcast %cst_25 : f32 to vector<24x24xf32>
    %79 = arith.select %37, %77, %78 : vector<24x24xi1>, vector<24x24xf32>
    %cst_26 = arith.constant dense<0xFF800000> : vector<24xf32>
    %80 = vector.multi_reduction <maximumf>, %79, %cst_26 [1] : vector<24x24xf32> to vector<24xf32>
    %81 = vector.shape_cast %80 : vector<24xf32> to vector<24x1xf32>
    %82 = vector.broadcast %81 : vector<24x1xf32> to vector<24x24xf32>
    %83 = arith.subf %79, %82 : vector<24x24xf32>
    %84 = math.exp %83 : vector<24x24xf32>
    %cst_27 = arith.constant dense<0.000000e+00> : vector<24xf32>
    %85 = vector.multi_reduction <add>, %84, %cst_27 [1] : vector<24x24xf32> to vector<24xf32>
    %86 = vector.shape_cast %85 : vector<24xf32> to vector<24x1xf32>
    %87 = tpu.reciprocal %86 {approx = true} : vector<24x1xf32> -> vector<24x1xf32>
    %88 = vector.broadcast %87 : vector<24x1xf32> to vector<24x24xf32>
    %89 = arith.mulf %84, %88 : vector<24x24xf32>
    %90 = arith.truncf %89 : vector<24x24xf32> to vector<24x24xbf16>
    %cst_28 = arith.constant dense<0.000000e+00> : vector<24x8xf32>
    %91 = tpu.matmul %90, %76, %cst_28 {dimension_numbers = #tpu.dot_dimension_numbers<[1], [0], [0], [1], [0, 0, 1, 1], [], []>} : vector<24x24xbf16>, vector<24x8xbf16>, vector<24x8xf32> -> vector<24x8xf32>
    %92 = vector.extract_strided_slice %30 {offsets = [0, 24], sizes = [24, 8], strides = [1, 1]} : vector<24x32xbf16> to vector<24x8xbf16>
    %93 = vector.extract_strided_slice %32 {offsets = [0, 24], sizes = [24, 8], strides = [1, 1]} : vector<24x32xbf16> to vector<24x8xbf16>
    %94 = vector.extract_strided_slice %34 {offsets = [0, 24], sizes = [24, 8], strides = [1, 1]} : vector<24x32xbf16> to vector<24x8xbf16>
    %cst_29 = arith.constant dense<0.000000e+00> : vector<24x24xf32>
    %95 = tpu.matmul %92, %93, %cst_29 {dimension_numbers = #tpu.dot_dimension_numbers<[1], [1], [0], [0], [0, 0, 1, 0], [], []>} : vector<24x8xbf16>, vector<24x8xbf16>, vector<24x24xf32> -> vector<24x24xf32>
    %cst_30 = arith.constant -1.000000e+30 : f32
    %96 = vector.broadcast %cst_30 : f32 to vector<24x24xf32>
    %97 = arith.select %37, %95, %96 : vector<24x24xi1>, vector<24x24xf32>
    %cst_31 = arith.constant dense<0xFF800000> : vector<24xf32>
    %98 = vector.multi_reduction <maximumf>, %97, %cst_31 [1] : vector<24x24xf32> to vector<24xf32>
    %99 = vector.shape_cast %98 : vector<24xf32> to vector<24x1xf32>
    %100 = vector.broadcast %99 : vector<24x1xf32> to vector<24x24xf32>
    %101 = arith.subf %97, %100 : vector<24x24xf32>
    %102 = math.exp %101 : vector<24x24xf32>
    %cst_32 = arith.constant dense<0.000000e+00> : vector<24xf32>
    %103 = vector.multi_reduction <add>, %102, %cst_32 [1] : vector<24x24xf32> to vector<24xf32>
    %104 = vector.shape_cast %103 : vector<24xf32> to vector<24x1xf32>
    %105 = tpu.reciprocal %104 {approx = true} : vector<24x1xf32> -> vector<24x1xf32>
    %106 = vector.broadcast %105 : vector<24x1xf32> to vector<24x24xf32>
    %107 = arith.mulf %102, %106 : vector<24x24xf32>
    %108 = arith.truncf %107 : vector<24x24xf32> to vector<24x24xbf16>
    %cst_33 = arith.constant dense<0.000000e+00> : vector<24x8xf32>
    %109 = tpu.matmul %108, %94, %cst_33 {dimension_numbers = #tpu.dot_dimension_numbers<[1], [0], [0], [1], [0, 0, 1, 1], [], []>} : vector<24x24xbf16>, vector<24x8xbf16>, vector<24x8xf32> -> vector<24x8xf32>
    %110 = tpu.concatenate %55, %73, %91, %109 in 1 : vector<24x8xf32>, vector<24x8xf32>, vector<24x8xf32>, vector<24x8xf32> -> vector<24x32xf32>
    %111 = arith.truncf %110 : vector<24x32xf32> to vector<24x32xbf16>
    %c0_34 = arith.constant 0 : index
    %c0_35 = arith.constant 0 : index
    %112 = vector.load %arg5[%c0_34, %c0_35] : memref<32x32xbf16, #tpu.memory_space<vmem>>, vector<32x32xbf16>
    %cst_36 = arith.constant dense<0.000000e+00> : vector<24x32xf32>
    %113 = tpu.matmul %111, %112, %cst_36 {dimension_numbers = #tpu.dot_dimension_numbers<[1], [0], [0], [1], [0, 0, 1, 1], [], []>} : vector<24x32xbf16>, vector<32x32xbf16>, vector<24x32xf32> -> vector<24x32xf32>
    %114 = arith.addf %1, %113 : vector<24x32xf32>
    %c0_37 = arith.constant 0 : index
    %c0_38 = arith.constant 0 : index
    %115 = vector.load %arg6[%c0_37, %c0_38] : memref<1x32xf32, #tpu.memory_space<vmem>>, vector<1x32xf32>
    %116 = vector.broadcast %115 : vector<1x32xf32> to vector<24x32xf32>
    %117 = arith.addf %114, %116 : vector<24x32xf32>
    %c0_39 = arith.constant 0 : index
    %c0_40 = arith.constant 0 : index
    %118 = vector.load %arg7[%c0_39, %c0_40] : memref<1x32xf32, #tpu.memory_space<vmem>>, vector<1x32xf32>
    %c0_41 = arith.constant 0 : index
    %c0_42 = arith.constant 0 : index
    %119 = vector.load %arg8[%c0_41, %c0_42] : memref<1x32xf32, #tpu.memory_space<vmem>>, vector<1x32xf32>
    %cst_43 = arith.constant dense<0.000000e+00> : vector<24xf32>
    %120 = vector.multi_reduction <add>, %117, %cst_43 [1] : vector<24x32xf32> to vector<24xf32>
    %121 = vector.shape_cast %120 : vector<24xf32> to vector<24x1xf32>
    %cst_44 = arith.constant 3.200000e+01 : f32
    %122 = vector.broadcast %cst_44 : f32 to vector<24x1xf32>
    %123 = arith.divf %121, %122 : vector<24x1xf32>
    %124 = vector.broadcast %123 : vector<24x1xf32> to vector<24x32xf32>
    %125 = arith.subf %117, %124 : vector<24x32xf32>
    %126 = arith.mulf %125, %125 : vector<24x32xf32>
    %cst_45 = arith.constant dense<0.000000e+00> : vector<24xf32>
    %127 = vector.multi_reduction <add>, %126, %cst_45 [1] : vector<24x32xf32> to vector<24xf32>
    %128 = vector.shape_cast %127 : vector<24xf32> to vector<24x1xf32>
    %cst_46 = arith.constant 3.200000e+01 : f32
    %129 = vector.broadcast %cst_46 : f32 to vector<24x1xf32>
    %130 = arith.divf %128, %129 : vector<24x1xf32>
    %cst_47 = arith.constant 9.99999974E-6 : f32
    %131 = vector.broadcast %cst_47 : f32 to vector<24x1xf32>
    %132 = arith.addf %130, %131 : vector<24x1xf32>
    %133 = math.rsqrt %132 : vector<24x1xf32>
    %134 = vector.broadcast %133 : vector<24x1xf32> to vector<24x32xf32>
    %135 = arith.mulf %125, %134 : vector<24x32xf32>
    %136 = vector.broadcast %118 : vector<1x32xf32> to vector<24x32xf32>
    %137 = arith.mulf %135, %136 : vector<24x32xf32>
    %138 = vector.broadcast %119 : vector<1x32xf32> to vector<24x32xf32>
    %139 = arith.addf %137, %138 : vector<24x32xf32>
    %140 = arith.truncf %139 : vector<24x32xf32> to vector<24x32xbf16>
    %c0_48 = arith.constant 0 : index
    %c0_49 = arith.constant 0 : index
    %141 = vector.load %arg9[%c0_48, %c0_49] : memref<32x128xbf16, #tpu.memory_space<vmem>>, vector<32x128xbf16>
    %cst_50 = arith.constant dense<0.000000e+00> : vector<24x128xf32>
    %142 = tpu.matmul %140, %141, %cst_50 {dimension_numbers = #tpu.dot_dimension_numbers<[1], [0], [0], [1], [0, 0, 1, 1], [], []>} : vector<24x32xbf16>, vector<32x128xbf16>, vector<24x128xf32> -> vector<24x128xf32>
    %c0_51 = arith.constant 0 : index
    %c0_52 = arith.constant 0 : index
    %143 = vector.load %arg10[%c0_51, %c0_52] : memref<1x128xf32, #tpu.memory_space<vmem>>, vector<1x128xf32>
    %144 = vector.broadcast %143 : vector<1x128xf32> to vector<24x128xf32>
    %145 = arith.addf %142, %144 : vector<24x128xf32>
    %cst_53 = arith.constant 5.000000e-01 : f32
    %146 = vector.broadcast %cst_53 : f32 to vector<24x128xf32>
    %147 = arith.mulf %146, %145 : vector<24x128xf32>
    %cst_54 = arith.constant 4.471500e-02 : f32
    %148 = vector.broadcast %cst_54 : f32 to vector<24x128xf32>
    %149 = arith.mulf %148, %145 : vector<24x128xf32>
    %150 = arith.mulf %149, %145 : vector<24x128xf32>
    %151 = arith.mulf %150, %145 : vector<24x128xf32>
    %152 = arith.addf %145, %151 : vector<24x128xf32>
    %cst_55 = arith.constant 0.797884583 : f32
    %153 = vector.broadcast %cst_55 : f32 to vector<24x128xf32>
    %154 = arith.mulf %153, %152 : vector<24x128xf32>
    %155 = math.tanh %154 : vector<24x128xf32>
    %cst_56 = arith.constant 1.000000e+00 : f32
    %156 = vector.broadcast %cst_56 : f32 to vector<24x128xf32>
    %157 = arith.addf %156, %155 : vector<24x128xf32>
    %158 = arith.mulf %147, %157 : vector<24x128xf32>
    %159 = arith.truncf %158 : vector<24x128xf32> to vector<24x128xbf16>
    %c0_57 = arith.constant 0 : index
    %c0_58 = arith.constant 0 : index
    %160 = vector.load %arg11[%c0_57, %c0_58] : memref<128x32xbf16, #tpu.memory_space<vmem>>, vector<128x32xbf16>
    %cst_59 = arith.constant dense<0.000000e+00> : vector<24x32xf32>
    %161 = tpu.matmul %159, %160, %cst_59 {dimension_numbers = #tpu.dot_dimension_numbers<[1], [0], [0], [1], [0, 0, 1, 1], [], []>} : vector<24x128xbf16>, vector<128x32xbf16>, vector<24x32xf32> -> vector<24x32xf32>
    %c0_60 = arith.constant 0 : index
    %c0_61 = arith.constant 0 : index
    %162 = vector.load %arg12[%c0_60, %c0_61] : memref<1x32xf32, #tpu.memory_space<vmem>>, vector<1x32xf32>
    %163 = vector.broadcast %162 : vector<1x32xf32> to vector<24x32xf32>
    %164 = arith.addf %161, %163 : vector<24x32xf32>
    %165 = arith.addf %117, %164 : vector<24x32xf32>
    %c0_62 = arith.constant 0 : index
    %c0_63 = arith.constant 0 : index
    %166 = vector.load %arg13[%c0_62, %c0_63] : memref<1x32xf32, #tpu.memory_space<vmem>>, vector<1x32xf32>
    %c0_64 = arith.constant 0 : index
    %c0_65 = arith.constant 0 : index
    %167 = vector.load %arg14[%c0_64, %c0_65] : memref<1x32xf32, #tpu.memory_space<vmem>>, vector<1x32xf32>
    %cst_66 = arith.constant dense<0.000000e+00> : vector<24xf32>
    %168 = vector.multi_reduction <add>, %165, %cst_66 [1] : vector<24x32xf32> to vector<24xf32>
    %169 = vector.shape_cast %168 : vector<24xf32> to vector<24x1xf32>
    %cst_67 = arith.constant 3.200000e+01 : f32
    %170 = vector.broadcast %cst_67 : f32 to vector<24x1xf32>
    %171 = arith.divf %169, %170 : vector<24x1xf32>
    %172 = vector.broadcast %171 : vector<24x1xf32> to vector<24x32xf32>
    %173 = arith.subf %165, %172 : vector<24x32xf32>
    %174 = arith.mulf %173, %173 : vector<24x32xf32>
    %cst_68 = arith.constant dense<0.000000e+00> : vector<24xf32>
    %175 = vector.multi_reduction <add>, %174, %cst_68 [1] : vector<24x32xf32> to vector<24xf32>
    %176 = vector.shape_cast %175 : vector<24xf32> to vector<24x1xf32>
    %cst_69 = arith.constant 3.200000e+01 : f32
    %177 = vector.broadcast %cst_69 : f32 to vector<24x1xf32>
    %178 = arith.divf %176, %177 : vector<24x1xf32>
    %cst_70 = arith.constant 9.99999997E-7 : f32
    %179 = vector.broadcast %cst_70 : f32 to vector<24x1xf32>
    %180 = arith.addf %178, %179 : vector<24x1xf32>
    %181 = math.rsqrt %180 : vector<24x1xf32>
    %182 = vector.broadcast %181 : vector<24x1xf32> to vector<24x32xf32>
    %183 = arith.mulf %173, %182 : vector<24x32xf32>
    %184 = vector.broadcast %166 : vector<1x32xf32> to vector<24x32xf32>
    %185 = arith.mulf %183, %184 : vector<24x32xf32>
    %186 = vector.broadcast %167 : vector<1x32xf32> to vector<24x32xf32>
    %187 = arith.addf %185, %186 : vector<24x32xf32>
    %188 = vector.extract_strided_slice %187 {offsets = [1, 0], sizes = [16, 32], strides = [1, 1]} : vector<24x32xf32> to vector<16x32xf32>
    %189 = vector.extract_strided_slice %188 {offsets = [11, 0], sizes = [5, 32], strides = [1, 1]} : vector<16x32xf32> to vector<5x32xf32>
    %190 = vector.extract_strided_slice %188 {offsets = [0, 0], sizes = [11, 32], strides = [1, 1]} : vector<16x32xf32> to vector<11x32xf32>
    %191 = tpu.concatenate %189, %190 in 0 : vector<5x32xf32>, vector<11x32xf32> -> vector<16x32xf32>
    %c0_71 = arith.constant 0 : index
    %c0_72 = arith.constant 0 : index
    %192 = vector.load %arg15[%c0_71, %c0_72] : memref<16x9xf32, #tpu.memory_space<vmem>>, vector<16x1xf32>
    %193 = vector.broadcast %192 : vector<16x1xf32> to vector<16x32xf32>
    %194 = arith.mulf %191, %193 : vector<16x32xf32>
    %195 = arith.truncf %194 : vector<16x32xf32> to vector<16x32xbf16>
    %196 = vector.extract_strided_slice %188 {offsets = [12, 0], sizes = [4, 32], strides = [1, 1]} : vector<16x32xf32> to vector<4x32xf32>
    %197 = vector.extract_strided_slice %188 {offsets = [0, 0], sizes = [12, 32], strides = [1, 1]} : vector<16x32xf32> to vector<12x32xf32>
    %198 = tpu.concatenate %196, %197 in 0 : vector<4x32xf32>, vector<12x32xf32> -> vector<16x32xf32>
    %c0_73 = arith.constant 0 : index
    %c1 = arith.constant 1 : index
    %199 = vector.load %arg15[%c0_73, %c1] : memref<16x9xf32, #tpu.memory_space<vmem>>, vector<16x1xf32>
    %200 = vector.broadcast %199 : vector<16x1xf32> to vector<16x32xf32>
    %201 = arith.mulf %198, %200 : vector<16x32xf32>
    %202 = arith.truncf %201 : vector<16x32xf32> to vector<16x32xbf16>
    %203 = vector.extract_strided_slice %188 {offsets = [13, 0], sizes = [3, 32], strides = [1, 1]} : vector<16x32xf32> to vector<3x32xf32>
    %204 = vector.extract_strided_slice %188 {offsets = [0, 0], sizes = [13, 32], strides = [1, 1]} : vector<16x32xf32> to vector<13x32xf32>
    %205 = tpu.concatenate %203, %204 in 0 : vector<3x32xf32>, vector<13x32xf32> -> vector<16x32xf32>
    %c0_74 = arith.constant 0 : index
    %c2 = arith.constant 2 : index
    %206 = vector.load %arg15[%c0_74, %c2] : memref<16x9xf32, #tpu.memory_space<vmem>>, vector<16x1xf32>
    %207 = vector.broadcast %206 : vector<16x1xf32> to vector<16x32xf32>
    %208 = arith.mulf %205, %207 : vector<16x32xf32>
    %209 = arith.truncf %208 : vector<16x32xf32> to vector<16x32xbf16>
    %210 = vector.extract_strided_slice %188 {offsets = [15, 0], sizes = [1, 32], strides = [1, 1]} : vector<16x32xf32> to vector<1x32xf32>
    %211 = vector.extract_strided_slice %188 {offsets = [0, 0], sizes = [15, 32], strides = [1, 1]} : vector<16x32xf32> to vector<15x32xf32>
    %212 = tpu.concatenate %210, %211 in 0 : vector<1x32xf32>, vector<15x32xf32> -> vector<16x32xf32>
    %c0_75 = arith.constant 0 : index
    %c3 = arith.constant 3 : index
    %213 = vector.load %arg15[%c0_75, %c3] : memref<16x9xf32, #tpu.memory_space<vmem>>, vector<16x1xf32>
    %214 = vector.broadcast %213 : vector<16x1xf32> to vector<16x32xf32>
    %215 = arith.mulf %212, %214 : vector<16x32xf32>
    %216 = arith.truncf %215 : vector<16x32xf32> to vector<16x32xbf16>
    %c0_76 = arith.constant 0 : index
    %c4 = arith.constant 4 : index
    %217 = vector.load %arg15[%c0_76, %c4] : memref<16x9xf32, #tpu.memory_space<vmem>>, vector<16x1xf32>
    %218 = vector.broadcast %217 : vector<16x1xf32> to vector<16x32xf32>
    %219 = arith.mulf %188, %218 : vector<16x32xf32>
    %220 = arith.truncf %219 : vector<16x32xf32> to vector<16x32xbf16>
    %221 = vector.extract_strided_slice %188 {offsets = [1, 0], sizes = [15, 32], strides = [1, 1]} : vector<16x32xf32> to vector<15x32xf32>
    %222 = vector.extract_strided_slice %188 {offsets = [0, 0], sizes = [1, 32], strides = [1, 1]} : vector<16x32xf32> to vector<1x32xf32>
    %223 = tpu.concatenate %221, %222 in 0 : vector<15x32xf32>, vector<1x32xf32> -> vector<16x32xf32>
    %c0_77 = arith.constant 0 : index
    %c5 = arith.constant 5 : index
    %224 = vector.load %arg15[%c0_77, %c5] : memref<16x9xf32, #tpu.memory_space<vmem>>, vector<16x1xf32>
    %225 = vector.broadcast %224 : vector<16x1xf32> to vector<16x32xf32>
    %226 = arith.mulf %223, %225 : vector<16x32xf32>
    %227 = arith.truncf %226 : vector<16x32xf32> to vector<16x32xbf16>
    %228 = vector.extract_strided_slice %188 {offsets = [3, 0], sizes = [13, 32], strides = [1, 1]} : vector<16x32xf32> to vector<13x32xf32>
    %229 = vector.extract_strided_slice %188 {offsets = [0, 0], sizes = [3, 32], strides = [1, 1]} : vector<16x32xf32> to vector<3x32xf32>
    %230 = tpu.concatenate %228, %229 in 0 : vector<13x32xf32>, vector<3x32xf32> -> vector<16x32xf32>
    %c0_78 = arith.constant 0 : index
    %c6 = arith.constant 6 : index
    %231 = vector.load %arg15[%c0_78, %c6] : memref<16x9xf32, #tpu.memory_space<vmem>>, vector<16x1xf32>
    %232 = vector.broadcast %231 : vector<16x1xf32> to vector<16x32xf32>
    %233 = arith.mulf %230, %232 : vector<16x32xf32>
    %234 = arith.truncf %233 : vector<16x32xf32> to vector<16x32xbf16>
    %235 = vector.extract_strided_slice %188 {offsets = [4, 0], sizes = [12, 32], strides = [1, 1]} : vector<16x32xf32> to vector<12x32xf32>
    %236 = vector.extract_strided_slice %188 {offsets = [0, 0], sizes = [4, 32], strides = [1, 1]} : vector<16x32xf32> to vector<4x32xf32>
    %237 = tpu.concatenate %235, %236 in 0 : vector<12x32xf32>, vector<4x32xf32> -> vector<16x32xf32>
    %c0_79 = arith.constant 0 : index
    %c7 = arith.constant 7 : index
    %238 = vector.load %arg15[%c0_79, %c7] : memref<16x9xf32, #tpu.memory_space<vmem>>, vector<16x1xf32>
    %239 = vector.broadcast %238 : vector<16x1xf32> to vector<16x32xf32>
    %240 = arith.mulf %237, %239 : vector<16x32xf32>
    %241 = arith.truncf %240 : vector<16x32xf32> to vector<16x32xbf16>
    %242 = vector.extract_strided_slice %188 {offsets = [5, 0], sizes = [11, 32], strides = [1, 1]} : vector<16x32xf32> to vector<11x32xf32>
    %243 = vector.extract_strided_slice %188 {offsets = [0, 0], sizes = [5, 32], strides = [1, 1]} : vector<16x32xf32> to vector<5x32xf32>
    %244 = tpu.concatenate %242, %243 in 0 : vector<11x32xf32>, vector<5x32xf32> -> vector<16x32xf32>
    %c0_80 = arith.constant 0 : index
    %c8 = arith.constant 8 : index
    %245 = vector.load %arg15[%c0_80, %c8] : memref<16x9xf32, #tpu.memory_space<vmem>>, vector<16x1xf32>
    %246 = vector.broadcast %245 : vector<16x1xf32> to vector<16x32xf32>
    %247 = arith.mulf %244, %246 : vector<16x32xf32>
    %248 = arith.truncf %247 : vector<16x32xf32> to vector<16x32xbf16>
    %249 = tpu.concatenate %195, %202, %209, %216, %220, %227, %234, %241, %248 in 1 : vector<16x32xbf16>, vector<16x32xbf16>, vector<16x32xbf16>, vector<16x32xbf16>, vector<16x32xbf16>, vector<16x32xbf16>, vector<16x32xbf16>, vector<16x32xbf16>, vector<16x32xbf16> -> vector<16x288xbf16>
    %c0_81 = arith.constant 0 : index
    %c0_82 = arith.constant 0 : index
    %250 = vector.load %arg16[%c0_81, %c0_82] : memref<288x128xbf16, #tpu.memory_space<vmem>>, vector<288x128xbf16>
    %cst_83 = arith.constant dense<0.000000e+00> : vector<16x128xf32>
    %251 = tpu.matmul %249, %250, %cst_83 {dimension_numbers = #tpu.dot_dimension_numbers<[1], [0], [0], [1], [0, 0, 1, 1], [], []>} : vector<16x288xbf16>, vector<288x128xbf16>, vector<16x128xf32> -> vector<16x128xf32>
    %c0_84 = arith.constant 0 : index
    %c0_85 = arith.constant 0 : index
    %252 = vector.load %arg17[%c0_84, %c0_85] : memref<1x128xf32, #tpu.memory_space<vmem>>, vector<1x128xf32>
    %253 = vector.broadcast %252 : vector<1x128xf32> to vector<16x128xf32>
    %254 = arith.addf %251, %253 : vector<16x128xf32>
    %c0_86 = arith.constant 0 : index
    %c0_87 = arith.constant 0 : index
    %c0_88 = arith.constant 0 : index
    %255 = vector.load %arg18[%c0_86, %c0_87, %c0_88] : memref<1x16x128xf32, #tpu.memory_space<vmem>>, vector<1x16x128xf32>
    %256 = vector.shape_cast %255 : vector<1x16x128xf32> to vector<16x128xf32>
    %257 = vector.shape_cast %254 : vector<16x128xf32> to vector<1x16x128xf32>
    tpu.vector_store %arg18[%c0_86, %c0_87, %c0_88], %257 {strides = array<i32>} : memref<1x16x128xf32, #tpu.memory_space<vmem>>, vector<1x16x128xf32>,
    %cst_89 = arith.constant dense<0.000000e+00> : vector<128xf32>
    %258 = vector.multi_reduction <add>, %254, %cst_89 [0] : vector<16x128xf32> to vector<128xf32>
    %259 = vector.shape_cast %258 : vector<128xf32> to vector<1x128xf32>
    %cst_90 = arith.constant 6.250000e-02 : f32
    %260 = vector.broadcast %cst_90 : f32 to vector<1x128xf32>
    %261 = arith.mulf %259, %260 : vector<1x128xf32>
    %c0_91 = arith.constant 0 : index
    %c0_92 = arith.constant 0 : index
    %c0_93 = arith.constant 0 : index
    %262 = vector.load %arg19[%c0_91, %c0_92, %c0_93] : memref<1x1x128xf32, #tpu.memory_space<vmem>>, vector<1x1x128xf32>
    %263 = vector.shape_cast %262 : vector<1x1x128xf32> to vector<1x128xf32>
    %264 = vector.shape_cast %261 : vector<1x128xf32> to vector<1x1x128xf32>
    tpu.vector_store %arg19[%c0_91, %c0_92, %c0_93], %264 {strides = array<i32>} : memref<1x1x128xf32, #tpu.memory_space<vmem>>, vector<1x1x128xf32>,
    return
  }
  func.func @transform_0(%arg0: i32) -> (i32, i32, i32) {
    %c0_i32 = arith.constant 0 : i32
    %c0_i32_0 = arith.constant 0 : i32
    %c0_i32_1 = arith.constant 0 : i32
    return %arg0, %c0_i32, %c0_i32_0 : i32, i32, i32
  }
  func.func @transform_1(%arg0: i32) -> (i32, i32) {
    %c0_i32 = arith.constant 0 : i32
    %c0_i32_0 = arith.constant 0 : i32
    %c0_i32_1 = arith.constant 0 : i32
    return %c0_i32, %c0_i32_0 : i32, i32
  }
  func.func @transform_2(%arg0: i32) -> (i32, i32) {
    %c0_i32 = arith.constant 0 : i32
    %c0_i32_0 = arith.constant 0 : i32
    %c0_i32_1 = arith.constant 0 : i32
    return %c0_i32, %c0_i32_0 : i32, i32
  }
  func.func @transform_3(%arg0: i32) -> (i32, i32) {
    %c0_i32 = arith.constant 0 : i32
    %c0_i32_0 = arith.constant 0 : i32
    %c0_i32_1 = arith.constant 0 : i32
    return %c0_i32, %c0_i32_0 : i32, i32
  }
  func.func @transform_4(%arg0: i32) -> (i32, i32) {
    %c0_i32 = arith.constant 0 : i32
    %c0_i32_0 = arith.constant 0 : i32
    %c0_i32_1 = arith.constant 0 : i32
    return %c0_i32, %c0_i32_0 : i32, i32
  }
  func.func @transform_5(%arg0: i32) -> (i32, i32) {
    %c0_i32 = arith.constant 0 : i32
    %c0_i32_0 = arith.constant 0 : i32
    %c0_i32_1 = arith.constant 0 : i32
    return %c0_i32, %c0_i32_0 : i32, i32
  }
  func.func @transform_6(%arg0: i32) -> (i32, i32) {
    %c0_i32 = arith.constant 0 : i32
    %c0_i32_0 = arith.constant 0 : i32
    %c0_i32_1 = arith.constant 0 : i32
    return %c0_i32, %c0_i32_0 : i32, i32
  }
  func.func @transform_7(%arg0: i32) -> (i32, i32) {
    %c0_i32 = arith.constant 0 : i32
    %c0_i32_0 = arith.constant 0 : i32
    %c0_i32_1 = arith.constant 0 : i32
    return %c0_i32, %c0_i32_0 : i32, i32
  }
  func.func @transform_8(%arg0: i32) -> (i32, i32) {
    %c0_i32 = arith.constant 0 : i32
    %c0_i32_0 = arith.constant 0 : i32
    %c0_i32_1 = arith.constant 0 : i32
    return %c0_i32, %c0_i32_0 : i32, i32
  }
  func.func @transform_9(%arg0: i32) -> (i32, i32) {
    %c0_i32 = arith.constant 0 : i32
    %c0_i32_0 = arith.constant 0 : i32
    %c0_i32_1 = arith.constant 0 : i32
    return %c0_i32, %c0_i32_0 : i32, i32
  }
  func.func @transform_10(%arg0: i32) -> (i32, i32) {
    %c0_i32 = arith.constant 0 : i32
    %c0_i32_0 = arith.constant 0 : i32
    %c0_i32_1 = arith.constant 0 : i32
    return %c0_i32, %c0_i32_0 : i32, i32
  }
  func.func @transform_11(%arg0: i32) -> (i32, i32) {
    %c0_i32 = arith.constant 0 : i32
    %c0_i32_0 = arith.constant 0 : i32
    %c0_i32_1 = arith.constant 0 : i32
    return %c0_i32, %c0_i32_0 : i32, i32
  }
  func.func @transform_12(%arg0: i32) -> (i32, i32) {
    %c0_i32 = arith.constant 0 : i32
    %c0_i32_0 = arith.constant 0 : i32
    %c0_i32_1 = arith.constant 0 : i32
    return %c0_i32, %c0_i32_0 : i32, i32
  }
  func.func @transform_13(%arg0: i32) -> (i32, i32) {
    %c0_i32 = arith.constant 0 : i32
    %c0_i32_0 = arith.constant 0 : i32
    %c0_i32_1 = arith.constant 0 : i32
    return %c0_i32, %c0_i32_0 : i32, i32
  }
  func.func @transform_14(%arg0: i32) -> (i32, i32) {
    %c0_i32 = arith.constant 0 : i32
    %c0_i32_0 = arith.constant 0 : i32
    %c0_i32_1 = arith.constant 0 : i32
    return %c0_i32, %c0_i32_0 : i32, i32
  }
  func.func @transform_15(%arg0: i32) -> (i32, i32) {
    %c0_i32 = arith.constant 0 : i32
    %c0_i32_0 = arith.constant 0 : i32
    %c0_i32_1 = arith.constant 0 : i32
    return %c0_i32, %c0_i32_0 : i32, i32
  }
  func.func @transform_16(%arg0: i32) -> (i32, i32) {
    %c0_i32 = arith.constant 0 : i32
    %c0_i32_0 = arith.constant 0 : i32
    %c0_i32_1 = arith.constant 0 : i32
    return %c0_i32, %c0_i32_0 : i32, i32
  }
  func.func @transform_17(%arg0: i32) -> (i32, i32, i32) {
    %c0_i32 = arith.constant 0 : i32
    %c0_i32_0 = arith.constant 0 : i32
    %c0_i32_1 = arith.constant 0 : i32
    return %arg0, %c0_i32, %c0_i32_0 : i32, i32, i32
  }
  func.func @transform_18(%arg0: i32) -> (i32, i32, i32) {
    %c0_i32 = arith.constant 0 : i32
    %c0_i32_0 = arith.constant 0 : i32
    %c0_i32_1 = arith.constant 0 : i32
    return %arg0, %c0_i32, %c0_i32_0 : i32, i32, i32
  }
}

</mosaic_0001>

<bundles_post_ra>
// kernel: tpu_custom_call.1
= control target key start
LH: loop header
LB: loop body
LE: loop exit
PB: predicated region body
PF: predicated region fallthrough
CT: control target
= control target key end

     0   :  { %s3657_s0 = inlined_call_operand.vmem [shape: f32[2,24,32], index: 0, kind: input, shape index: {}]   ;;  %s3658_s1 = inlined_call_operand.hbm [shape: f32[1,32], index: 1, kind: input, shape index: {}]   ;;  %s3659_s2 = inlined_call_operand.vmem [shape: f32[1,32], index: 2, kind: input, shape index: {}]   ;;  %s3660_s3 = inlined_call_operand.vmem [shape: bf16[32,96], index: 3, kind: input, shape index: {}]   ;;  %s3661_s4 = inlined_call_operand.vmem [shape: bf16[32,32], index: 4, kind: input, shape index: {}]   ;;  %s3662_s5 = inlined_call_operand.vmem [shape: f32[1,32], index: 5, kind: input, shape index: {}]   ;;  %s3663_s6 = inlined_call_operand.vmem [shape: f32[1,32], index: 6, kind: input, shape index: {}]   ;;  %s3664_s7 = inlined_call_operand.vmem [shape: f32[1,32], index: 7, kind: input, shape index: {}]   ;;  %s3665_s8 = inlined_call_operand.hbm [shape: bf16[32,128], index: 8, kind: input, shape index: {}]   ;;  %s3666_s9 = inlined_call_operand.vmem [shape: f32[1,128], index: 9, kind: input, shape index: {}]   ;;  %s3667_s10 = inlined_call_operand.vmem [shape: bf16[128,32], index: 10, kind: input, shape index: {}]   ;;  %s3668_s11 = inlined_call_operand.vmem [shape: f32[1,32], index: 11, kind: input, shape index: {}]   ;;  %s3669_s12 = inlined_call_operand.vmem [shape: f32[1,32], index: 12, kind: input, shape index: {}]   ;;  %s3670_s13 = inlined_call_operand.vmem [shape: f32[1,32], index: 13, kind: input, shape index: {}]   ;;  %s3671_s14 = inlined_call_operand.hbm [shape: f32[16,9], index: 14, kind: input, shape index: {}]   ;;  %s3672_s15 = inlined_call_operand.hbm [shape: bf16[288,128], index: 15, kind: input, shape index: {}]   ;;  %s3673_s16 = inlined_call_operand.vmem [shape: f32[1,128], index: 16, kind: input, shape index: {}]   ;;  %s3674_s17 = inlined_call_operand.hbm [shape: f32[2,16,128], index: 17, kind: output, shape index: {0}]   ;;  %s3675_s18 = inlined_call_operand.hbm [shape: f32[2,1,128], index: 18, kind: output, shape index: {1}]  }
   0x1   :  { %3687 = sst [smem:[#allocation26_spill]] %s3657_s0 }
   0x2   :  { %3688 = sst [smem:[#allocation27_spill]] %s3658_s1 }
   0x3   :  { %3689 = sst [smem:[#allocation28_spill]] %s3659_s2 }
   0x4   :  { %3690 = sst [smem:[#allocation29_spill]] %s3665_s8 }
   0x5   :  { %3691 = sst [smem:[#allocation30_spill]] %s3673_s16 }
   0x6   :  { %3692 = sst [smem:[#allocation31_spill]] %s3674_s17 }
   0x7   :  { %3693 = sst [smem:[#allocation32_spill]] %s3675_s18 }
   0x8   :  { %24 = vsyncpa [#allocation3], 0 }
   0x9   :  { %25 = vsyncpa [#allocation6], 0 }
   0xa   :  { %26 = vsyncpa [#allocation9], 0 }
   0xb   :  { %27 = vsyncpa [#allocation4], 0 }
   0xc   :  { %29 = vsyncpa [#allocation4 + $0x1], 0 }
   0xd   :  { %30 = vsyncpa [#allocation12], 0 }
   0xe   :  { %32 = vsyncpa [#allocation12 + $0x1], 0  ;;  %s3080_s27 = smov 0   ;;  %s3082_s28 = smov 0  }
   0xf   :  { %s3084_s29 = smov 0   ;;  %s3086_s30 = smov 0  }
  0x10 LB: > { %3694 = sst [smem:[#allocation18_spill]] %s2937_s27  ;;  %s3101_s0 = sadd.s32 4294967295, %s2949_s30   ;;  %s2949_s30 = sphi %s3086_s30, %s3718_s30   ;;  %s2945_s29 = sphi %s3084_s29, %s3721_s29   ;;  %s2941_s28 = sphi %s3082_s28, %s3720_s28   ;;  %s2937_s27 = sphi %s3080_s27, %s3719_s27  }
  0x11   : > { %3695 = sst [smem:[#allocation19_spill]] %s2941_s28  ;;  %s2287_s19 = sadd.s32 4294967294, %s2949_s30  }
  0x12   : > { %3696 = sst [smem:[#allocation20_spill]] %s2945_s29  ;;  %s3105_s1 = sadd.s32 1, %s2949_s30  }
  0x13   : > { %3697 = sst [smem:[#allocation21_spill]] %s2949_s30  ;;  %s407_s20 = sadd.s32 1, %s2945_s29 }
  0x14   : > { %3698 = sst [smem:[#allocation22_spill]] %s3105_s1  ;;  %s404_s21 = ssub.s32 %s2949_s30, %s3105_s1 }
  0x15   : > { %p417_p0 = scmp.ne.s32.totalorder %s2945_s29, %s2941_s28  ;;  %p405_p1 = scmp.eq.s32.totalorder %s404_s21, 0 }
  0x16   : > { %p418_p2 = scmp.eq.s32.totalorder %s3101_s0, 1  ;;  %p423_p3 = scmp.ne.s32.totalorder %s2941_s28, %s2937_s27 }
  0x17   : > { %p424_p4 = scmp.eq.s32.totalorder %s2287_s19, 1  ;;  %p2288_p7 = scmp.ge.s32.totalorder %s2949_s30, 1 }
  0x18   : > { %s3116_s22 = scalar_select %p405_p1, %s2945_s29, %s407_s20  }
  0x19   : > { %p3118_p5 = por %p418_p2, %p417_p0  ;;  %p3122_p6 = por %p424_p4, %p423_p3 }
  0x1a   : > { %3699 = sst [smem:[#allocation23_spill]] %s3116_s22  ;;  %p457_p8 = scmp.lt.s32.totalorder %s2949_s30, 3 }
  0x1b   : > { %s3700_s2 = scalar_select %p3118_p5, 1, 0 }
  0x1c   : > { %s3702_s23 = scalar_select %p3122_p6, 1, 0 }
  0x1d   : > { %3701 = sst [smem:[#allocation24_spill]] %s3700_s2  ;;  %p2531_p9 = scmp.eq.s32.totalorder %s3101_s0, 0 }
  0x1e   : > { %3703 = sst [smem:[#allocation25_spill]] %s3702_s23  ;;  %p3129_p10 = pnand %p2288_p7, %p457_p8 }
  0x1f   : > { %s3705_s8 = sld [smem:[#allocation29_spill]]  ;;  %s2951_s20 = smov [#allocation5]  }
  0x20   : > { %p2511_p11 = pneg %p3129_p10  ;;  %s500_s21 = sshll.u32 %s2951_s20, 4  ;;  %s501_s21 = int_to_ptr.vmem [resolvable:$true] %s500_s21 }
  0x21   : > { %s3707_s23 = sld [smem:[#allocation27_spill]]  ;;  %s2952_s25 = smov 64  }
  0x22   : > { %p3140_p12 = pnand %p2531_p9, %p2511_p11  ;;  %s2953_s26 = smov 4  }
  0x23   : > { %s527_s2 = sshll.u32 %s3671_s14, 4  ;;  %s2955_s29 = smov [#allocation7]   ;;  %s528_s2 = int_to_ptr.hbm [resolvable:$true] %s527_s2 }
  0x24   : > { %s529_s1 = sshll.u32 %s2955_s29, 4  ;;  %s541_s16 = sshll.u32 %s3672_s15, 4  ;;  %s530_s1 = int_to_ptr.vmem [resolvable:$true] %s529_s1  ;;  %s542_s16 = int_to_ptr.hbm [resolvable:$true] %s541_s16 }
  0x25   : > { %s498_s19 = sshll.u32 %s3705_s8, 4  ;;  %s2954_s8 = smov [#allocation2]   ;;  %s499_s19 = int_to_ptr.hbm [resolvable:$true] %s498_s19 }
  0x26   : > { %2517 = dma.hbm_to_vmem [thread:$0]  (!%p3140_p12), %s499_s19, 256, %s501_s21, [#allocation6], %s2952_s25, %s2952_s25, %s2953_s26  }
  0x27   : > { %s469_s27 = sshll.u32 %s3707_s23, 4  ;;  %s471_s20 = sshll.u32 %s2954_s8, 4  ;;  %s470_s27 = int_to_ptr.hbm [resolvable:$true] %s469_s27  ;;  %s472_s20 = int_to_ptr.vmem [resolvable:$true] %s471_s20 }
  0x28   : > { %2514 = dma.hbm_to_vmem [thread:$0]  (!%p3140_p12), %s470_s27, 16, %s472_s20, [#allocation3]  }
  0x29   : > { %s2956_s28 = smov 128   ;;  %s2957_s19 = smov 8  }
  0x2a   : > { %2520 = dma.hbm_to_vmem [thread:$0]  (!%p3140_p12), %s528_s2, 256, %s530_s1, [#allocation6], %s2956_s28, %s2956_s28, %s2957_s19  }
  0x2b   : > { %s2958_s8 = smov [#allocation8]   ;;  %570 = sbr.rel (%p3129_p10) target bundleno = 3150 (0xc4e), region = 88 }
  0x2c   : > { %s543_s18 = sshll.u32 %s2958_s8, 4  ;;  %s544_s18 = int_to_ptr.vmem [resolvable:$true] %s543_s18 }
  0x2d   : > { %2523 = dma.hbm_to_vmem [thread:$0]  (!%p3140_p12), %s542_s16, 2304, %s544_s18, [#allocation9], %s2952_s25, %s2952_s25, %s2953_s26  }
  0x30   : > { %2916 = dma.done.wait (%p2531_p9), [#allocation3], 16  }
  0x31   : > { %2918 = vsyncadd (%p2531_p9), [#allocation3], 4294967280 }
  0x32   : > { %2920 = dma.done.wait (%p2531_p9), [#allocation6], 512  }
  0x33   : > { %2922 = vsyncadd (%p2531_p9), [#allocation6], 4294966784 }
  0x34   : > { %2924 = dma.done.wait (%p2531_p9), [#allocation9], 2304  }
  0x35   : > { %2926 = vsyncadd (%p2531_p9), [#allocation9], 4294964992  ;;  %p644_p13 = scmp.lt.s32.totalorder %s3101_s0, 1  ;;  %vm655_vm0 = vcmask 261120   ;;  %s3708_s30 = sld [smem:[#allocation26_spill]]  ;;  %v2959_v6 = vmov 32.0  }
  0x36   : > { %2649 = vrcp.f32 %v2959_v6  ;;  %v2458_v28 = vld [vmem:[%s3660_s3 + $0x8] sm:$0xff]  ;;  %v2457_v31 = vld [vmem:[%s3660_s3] sm:$0xff]  ;;  %s3709_s29 = sld [smem:[#allocation28_spill]]  ;;  %s2960_s1 = smov 96   ;;  %vm815_vm11 = vcmask 64512   ;;  %vm896_vm12 = vcmask 1043456  }
  0x37   : > { %s645_s16 = scalar_select %p644_p13, %s3101_s0, 1  ;;  %771 = vmatpush.bf16.msra.mxu0 %v2458_v28  ;;  %v2639_v53 = vld [vmem:[#allocation2] ss:$0 sm:$0xff]  ;;  %vm849_vm14 = vcmask 195584   ;;  %vm1281_vm15 = vcmask 130048  }
  0x38   : > { %s2961_s23 = smov 88   ;;  %s2962_s19 = smov 64  }
  0x39   : > { %s2490_s17 = smul.u32 24, %s645_s16  ;;  %s2963_s8 = smov 120  }
  0x3a   : > { %s2964_s18 = smov 80   ;;  %s2965_s16 = smov 72  }
  0x3b   : > { %s648_s22 = scalar_lea.vmem %s3708_s30, %s2490_s17  ;;  %772 = vmatpush.bf16.msra.mxu0 %v2457_v31  ;;  %s2966_s17 = smov 104  }
  0x3c   : > { %v3180_v0 = vld [vmem:[%s648_s22] sm:$0xff]  ;;  %v3182_v1 = vld [vmem:[%s648_s22 + $0x10] sm:$0xff]  ;;  %v3188_v4 = vld [vmem:[%s648_s22 + $0x8] sm:$0xff]  ;;  %v2650_v7 = vpop.eup %2649  ;;  %s2967_s27 = smov 112   ;;  %s2968_s28 = smov 56  }
  0x3d   : > { %v656_v2 = vsel %vm655_vm0, %v3180_v0, 0.0  ;;  %v662_v3 = vsel %vm655_vm0, %v3182_v1, 0.0  ;;  %v659_v5 = vsel %vm655_vm0, %v3188_v4, 0.0  ;;  %v666_v8 = vmul.f32 32.0, %v2650_v7  ;;  %v2640_v60 = vld [vmem:[%s3709_s29] ss:$0 sm:$0xff] }
  0x3e   : > { %657 = vadd.xlane.f32.xlu0 %v656_v2  ;;  %663 = vadd.xlane.f32.xlu1 %v662_v3  ;;  %vm670_vm1 = vweird.f32 %v2650_v7  ;;  %s2969_s30 = smov 48   ;;  %s2970_s22 = smov 40  }
  0x3f   : > { %v667_v9 = vsub.f32 1.0, %v666_v8  ;;  %s2971_s2 = smov 8   ;;  %s2972_s24 = smov 16  }
  0x40   : > { %s2973_s21 = smov 24  }
  0x41   : > { %v668_v10 = vmul.f32 %v2650_v7, %v667_v9 }
  0x43   : > { %v669_v11 = vadd.f32 %v2650_v7, %v668_v10 }
  0x45   : > { %v3192_v12 = vsel %vm670_vm1, %v2650_v7, %v669_v11 }
  0x46   : > { %660 = vadd.xlane.f32.xlu0 %v659_v5 }
  0xb1   : > { %v658_v13 = vpop.xlane.xlu0 %657  ;;  %v664_v17 = vpop.xlane.xlu1 %663 }
  0xb2   : > { %v672_v14 = vmul.f32 %v3192_v12, %v658_v13  ;;  %v674_v21 = vmul.f32 %v3192_v12, %v664_v17 }
  0xb4   : > { %v675_v15 = vsub.f32 %v3180_v0, %v672_v14  ;;  %v3201_v23 = vsub.f32 %v3182_v1, %v674_v21 }
  0xb6   : > { %v678_v16 = vmul.f32 %v675_v15, %v675_v15  ;;  %v680_v26 = vmul.f32 %v3201_v23, %v3201_v23 }
  0xb8   : > { %v681_v18 = vsel %vm655_vm0, %v678_v16, 0.0  ;;  %v687_v27 = vsel %vm655_vm0, %v680_v26, 0.0 }
  0xb9   : > { %682 = vadd.xlane.f32.xlu1 %v681_v18  ;;  %v661_v19 = vpop.xlane.xlu0 %660 }
  0xba   : > { %v673_v20 = vmul.f32 %v3192_v12, %v661_v19 }
  0xbc   : > { %v676_v22 = vsub.f32 %v3188_v4, %v673_v20 }
  0xbe   : > { %v679_v24 = vmul.f32 %v676_v22, %v676_v22 }
  0xc0   : > { %v684_v25 = vsel %vm655_vm0, %v679_v24, 0.0 }
  0xc1   : > { %685 = vadd.xlane.f32.xlu2 %v684_v25 }
  0xc9   : > { %688 = vadd.xlane.f32.xlu2 %v687_v27 }
 0x12c   : > { %v683_v29 = vpop.xlane.xlu1 %682 }
 0x12d   : > { %v690_v30 = vmul.f32 %v683_v29, %v3192_v12 }
 0x12f   : > { %v693_v32 = vadd.f32 1e-05, %v690_v30 }
 0x131   : > { %2651 = vrsqrt.f32 %v693_v32  ;;  %vm702_vm3 = vweird.f32 %v693_v32 }
 0x134   : > { %v686_v33 = vpop.xlane.xlu2 %685 }
 0x135   : > { %v691_v34 = vmul.f32 %v686_v33, %v3192_v12 }
 0x137   : > { %v2652_v35 = vpop.eup %2651  ;;  %v694_v36 = vadd.f32 1e-05, %v691_v34 }
 0x138   : > { %v697_v37 = vmul.f32 %v2652_v35, %v693_v32  ;;  %vm703_vm2 = vweird.f32 %v2652_v35 }
 0x139   : > { %2653 = vrsqrt.f32 %v694_v36  ;;  %vm704_vm4 = vmor %vm702_vm3, %vm703_vm2  ;;  %vm712_vm6 = vweird.f32 %v694_v36 }
 0x13a   : > { %v698_v38 = vmul.f32 %v2652_v35, %v697_v37 }
 0x13c   : > { %v699_v39 = vmul.f32 0.5, %v698_v38  ;;  %v689_v40 = vpop.xlane.xlu2 %688 }
 0x13d   : > { %v692_v41 = vmul.f32 %v689_v40, %v3192_v12 }
 0x13e   : > { %v700_v42 = vsub.f32 1.5, %v699_v39 }
 0x13f   : > { %v2654_v43 = vpop.eup %2653  ;;  %v695_v44 = vadd.f32 1e-05, %v692_v41 }
 0x140   : > { %v701_v45 = vmul.f32 %v2652_v35, %v700_v42  ;;  %v707_v46 = vmul.f32 %v2654_v43, %v694_v36  ;;  %vm713_vm5 = vweird.f32 %v2654_v43 }
 0x141   : > { %2655 = vrsqrt.f32 %v695_v44  ;;  %vm714_vm7 = vmor %vm712_vm6, %vm713_vm5  ;;  %vm722_vm8 = vweird.f32 %v695_v44 }
 0x142   : > { %v708_v47 = vmul.f32 %v2654_v43, %v707_v46  ;;  %v705_v48 = vsel %vm704_vm4, %v2652_v35, %v701_v45  ;;  %v792_v45 = vlaneseq }
 0x143   : > { %v726_v52 = vmul.f32 %v705_v48, %v675_v15 }
 0x144   : > { %v709_v49 = vmul.f32 0.5, %v708_v47  ;;  %v3247_v46 = vand.u32 127, %v792_v45 }
 0x145   : > { %v732_v59 = vmul.f32 %v2639_v53, %v726_v52 }
 0x146   : > { %v710_v50 = vsub.f32 1.5, %v709_v49  ;;  %vm794_vm13 = vcmp.lt.s32.totalorder %v3247_v46, 17 }
 0x147   : > { %v2656_v51 = vpop.eup %2655  ;;  %v738_v2 = vadd.f32 %v2640_v60, %v732_v59 }
 0x148   : > { %v711_v54 = vmul.f32 %v2654_v43, %v710_v50  ;;  %v717_v55 = vmul.f32 %v2656_v51, %v695_v44  ;;  %vm723_vm9 = vweird.f32 %v2656_v51 }
 0x149   : > { %vm724_vm10 = vmor %vm722_vm8, %vm723_vm9 }
 0x14a   : > { %v715_v56 = vsel %vm714_vm7, %v2654_v43, %v711_v54  ;;  %v718_v57 = vmul.f32 %v2656_v51, %v717_v55 }
 0x14b   : > { %v727_v58 = vmul.f32 %v715_v56, %v676_v22 }
 0x14c   : > { %v719_v61 = vmul.f32 0.5, %v718_v57 }
 0x14d   : > { %v733_v62 = vmul.f32 %v2639_v53, %v727_v58 }
 0x14e   : > { %v720_v63 = vsub.f32 1.5, %v719_v61 }
 0x14f   : > { %v739_v3 = vadd.f32 %v2640_v60, %v733_v62 }
 0x150   : > { %v721_v5 = vmul.f32 %v2656_v51, %v720_v63 }
 0x151   : > { %v741_v6 = vpack.c.bf16 %v739_v3, %v738_v2 }
 0x152   : > { %v725_v7 = vsel %vm724_vm10, %v2656_v51, %v721_v5 }
 0x153   : > { %2309 = vmatmul.msk.bf16.vlgmr.msra.gmra.mxu0 %vm655_vm0, %v741_v6  ;;  %v728_v8 = vmul.f32 %v725_v7, %v3201_v23 }
 0x155   : > { %v734_v9 = vmul.f32 %v2639_v53, %v728_v8 }
 0x157   : > { %v740_v10 = vadd.f32 %v2640_v60, %v734_v9 }
 0x159   : > { %v742_v11 = vpack.c.bf16 %v740_v10, %v740_v10 }
 0x163   : > { %2310 = vmatmul.msk.bf16.gmra.mxu0 %vm655_vm0, %v742_v11 }
 0x1d0   : > { %v774_v13 = vpop.f32.mrf.mxu0 }
 0x1d1   : > { %v789_v14 = vpack.c.bf16 %v774_v13, %v774_v13  ;;  %v783_v26 = vmul.f32 0.35355338, %v774_v13 }
 0x1d3   : > { %v806_v17 = vunpack.c.l.b16 %v789_v14  ;;  %v786_v28 = vpack.c.bf16 %v783_v26, %v783_v26 }
 0x1d5   : > { %v798_v30 = vunpack.c.l.b16 %v786_v28 }
 0x1d8   : > { %v776_v15 = vpop.f32.mrf.mxu0 }
 0x1d9   : > { %v790_v16 = vpack.c.bf16 %v776_v15, %v776_v15  ;;  %v784_v25 = vmul.f32 0.35355338, %v776_v15 }
 0x1db   : > { %v807_v18 = vunpack.c.l.b16 %v790_v16  ;;  %v787_v27 = vpack.c.bf16 %v784_v25, %v784_v25 }
 0x1dd   : > { %v3222_v19 = vpack.c.b16 %v807_v18, %v806_v17  ;;  %v799_v29 = vunpack.c.l.b16 %v787_v27 }
 0x1df   : > { %811 = vrot.lane.b32.xlu1 %v3222_v19, %s2960_s1  ;;  %v3236_v31 = vpack.c.b16 %v799_v29, %v798_v30 }
 0x1e0   : > { %v779_v20 = vpop.f32.mrf.mxu0 }
 0x1e1   : > { %v791_v21 = vpack.c.bf16 %v779_v20, %v779_v20  ;;  %v785_v40 = vmul.f32 0.35355338, %v779_v20 }
 0x1e3   : > { %v808_v22 = vunpack.c.l.b16 %v791_v21  ;;  %v788_v41 = vpack.c.bf16 %v785_v40, %v785_v40 }
 0x1e5   : > { %v3226_v23 = vpack.c.b16 %v808_v22, %v808_v22  ;;  %v800_v43 = vunpack.c.l.b16 %v788_v41 }
 0x1e7   : > { %813 = vrot.lane.b32.xlu0 %v3226_v23, %s2960_s1  ;;  %v802_v44 = vpack.c.b16 %v800_v43, %v800_v43 }
 0x1e8   : > { %v781_v24 = vpop.f32.mrf.mxu0 }
 0x1ef   : > { %924 = vrot.lane.b32.xlu0 %v3226_v23, %s2961_s23 }
 0x1f7   : > { %887 = vrot.lane.b32.xlu0 %v3226_v23, %s2962_s19 }
 0x1ff   : > { %885 = vrot.lane.b32.xlu0 %v3222_v19, %s2962_s19 }
 0x207   : > { %918 = vrot.lane.b32.xlu0 %v3236_v31, %s2963_s8 }
 0x251   : > { %v812_v34 = vpop.permute.xlu1 %811 }
 0x252   : > { %v823_v36 = vsel %vm815_vm11, %v812_v34, 0 }
 0x259   : > { %v814_v32 = vpop.permute.xlu0 %813 }
 0x25a   : > { %v826_v33 = vsel %vm815_vm11, %v814_v32, 0 }
 0x25b   : > { %834 = vmatpush.bf16.xpose.msra.mxu1 %v826_v33 }
 0x261   : > { %v925_v35 = vpop.permute.xlu0 %924 }
 0x262   : > { %v936_v37 = vsel %vm815_vm11, %v925_v35, 0 }
 0x263   : > { %835 = vmatpush.bf16.xpose.msra.mxu1 %v823_v36  ;;  %944 = vmatpush.bf16.xpose.msra.mxu3 %v936_v37 }
 0x269   : > { %v888_v38 = vpop.permute.xlu0 %887 }
 0x26a   : > { %2311 = vmatmul.msk.bf16.vlgmr.msra.gmra.mxu1 %vm815_vm11, %v3236_v31  ;;  %v898_v39 = vsel %vm896_vm12, %v888_v38, 0 }
 0x26b   : > { %906 = vmatpush.bf16.msra.mxu2 %v898_v39 }
 0x271   : > { %v886_v42 = vpop.permute.xlu0 %885 }
 0x272   : > { %907 = vmatpush.bf16.msra.mxu2 %v886_v42 }
 0x279   : > { %v919_v8 = vpop.permute.xlu0 %918 }
 0x27a   : > { %2312 = vmatmul.msk.bf16.gmra.mxu1 %vm815_vm11, %v802_v44 }
 0x2e7   : > { %v837_v47 = vpop.f32.mrf.mxu1 }
 0x2e8   : > { %v846_v48 = vsel %vm794_vm13, %v837_v47, -1e+30 }
 0x2e9   : > { %v850_v49 = vsel %vm849_vm14, %v846_v48, -inf }
 0x2ea   : > { %851 = vmax.xlane.f32.xlu2 %v850_v49 }
 0x2ef   : > { %v839_v50 = vpop.f32.mrf.mxu1 }
 0x2f0   : > { %v847_v51 = vsel %vm794_vm13, %v839_v50, -1e+30 }
 0x2f1   : > { %v853_v52 = vsel %vm849_vm14, %v847_v51, -inf }
 0x2f2   : > { %854 = vmax.xlane.f32.xlu2 %v853_v52 }
 0x2f7   : > { %v842_v53 = vpop.f32.mrf.mxu1 }
 0x2f8   : > { %v848_v55 = vsel %vm794_vm13, %v842_v53, -1e+30 }
 0x2f9   : > { %v856_v56 = vsel %vm849_vm14, %v848_v55, -inf }
 0x2ff   : > { %v844_v54 = vpop.f32.mrf.mxu1 }
 0x30a   : > { %922 = vrot.lane.b32.xlu2 %v3222_v19, %s2961_s23  ;;  %s2983_s23 = smov 32  }
 0x333   : > { %857 = vmax.xlane.f32.xlu2 %v856_v56 }
 0x35d   : > { %v852_v57 = vpop.xlane.xlu2 %851 }
 0x35e   : > { %v859_v58 = vsub.f32 %v846_v48, %v852_v57 }
 0x360   : > { %v862_v59 = vmul.f32 1.442695, %v859_v58 }
 0x362   : > { %2657 = vpow2.f32 %v862_v59 }
 0x365   : > { %v855_v60 = vpop.xlane.xlu2 %854 }
 0x366   : > { %v860_v61 = vsub.f32 %v847_v51, %v855_v60 }
 0x368   : > { %v2658_v62 = vpop.eup %2657  ;;  %v864_v63 = vmul.f32 1.442695, %v860_v61 }
 0x369   : > { %v868_v2 = vsel %vm849_vm14, %v2658_v62, 0.0 }
 0x36a   : > { %2659 = vpow2.f32 %v864_v63  ;;  %869 = vadd.xlane.f32.xlu2 %v868_v2 }
 0x36d   : > { %v923_v3 = vpop.permute.xlu2 %922 }
 0x36e   : > { %v933_v5 = vsel %vm815_vm11, %v923_v3, 0 }
 0x36f   : > { %945 = vmatpush.bf16.xpose.msra.mxu3 %v933_v5 }
 0x370   : > { %v2660_v6 = vpop.eup %2659 }
 0x371   : > { %v871_v7 = vsel %vm849_vm14, %v2660_v6, 0.0 }
 0x372   : > { %872 = vadd.xlane.f32.xlu1 %v871_v7 }
 0x376   : > { %2315 = vmatmul.msk.bf16.vlgmr.msra.gmra.mxu3 %vm815_vm11, %v919_v8 }
 0x382   : > { %1032 = vrot.lane.b32.xlu2 %v3226_v23, %s2964_s18 }
 0x38a   : > { %920 = vrot.lane.b32.xlu2 %v802_v44, %s2963_s8 }
 0x38b   : > { %1140 = vrot.lane.b32.xlu1 %v3226_v23, %s2965_s16 }
 0x392   : > { %1030 = vrot.lane.b32.xlu2 %v3222_v19, %s2964_s18  ;;  %s3711_s18 = sld [smem:[#allocation30_spill]] }
 0x393   : > { %1134 = vrot.lane.b32.xlu1 %v3236_v31, %s2966_s17 }
 0x39a   : > { %1138 = vrot.lane.b32.xlu2 %v3222_v19, %s2965_s16 }
 0x3a2   : > { %1026 = vrot.lane.b32.xlu2 %v3236_v31, %s2967_s27 }
 0x3a6   : > { %v858_v9 = vpop.xlane.xlu2 %857 }
 0x3a7   : > { %v861_v10 = vsub.f32 %v848_v55, %v858_v9 }
 0x3a9   : > { %v866_v11 = vmul.f32 1.442695, %v861_v10 }
 0x3aa   : > { %1136 = vrot.lane.b32.xlu2 %v802_v44, %s2966_s17 }
 0x3ab   : > { %2661 = vpow2.f32 %v866_v11 }
 0x3b1   : > { %v2662_v13 = vpop.eup %2661 }
 0x3b2   : > { %v874_v14 = vsel %vm849_vm14, %v2662_v13, 0.0 }
 0x3b3   : > { %875 = vadd.xlane.f32.xlu0 %v874_v14 }
 0x3c7   : > { %1028 = vrot.lane.b32.xlu0 %v802_v44, %s2967_s27  ;;  %s2489_s27 = sshll.u32 %s3101_s0, 4 }
 0x3dd   : > { %v870_v15 = vpop.xlane.xlu2 %869 }
 0x3de   : > { %2663 = vrcp.f32 %v870_v15 }
 0x3e4   : > { %v2664_v20 = vpop.eup %2663 }
 0x3e5   : > { %v873_v16 = vpop.xlane.xlu1 %872  ;;  %v1033_v17 = vpop.permute.xlu2 %1032  ;;  %v880_v24 = vmul.f32 %v2664_v20, %v2658_v62 }
 0x3e6   : > { %2665 = vrcp.f32 %v873_v16  ;;  %v1044_v18 = vsel %vm815_vm11, %v1033_v17, 0 }
 0x3e7   : > { %1052 = vmatpush.bf16.xpose.msrb.mxu2 %v1044_v18 }
 0x3ec   : > { %v2666_v21 = vpop.eup %2665 }
 0x3ed   : > { %v921_v22 = vpop.permute.xlu2 %920  ;;  %v881_v25 = vmul.f32 %v2666_v21, %v2660_v6 }
 0x3ee   : > { %2316 = vmatmul.msk.bf16.gmra.mxu3 %vm815_vm11, %v921_v22 }
 0x3ef   : > { %v883_v26 = vpack.c.bf16 %v881_v25, %v880_v24 }
 0x3f1   : > { %2313 = vmatmul.msk.bf16.vlgmr.msra.gmra.mxu2 %vm849_vm14, %v883_v26 }
 0x3f5   : > { %v1031_v27 = vpop.permute.xlu2 %1030 }
 0x3f6   : > { %v1041_v28 = vsel %vm815_vm11, %v1031_v27, 0 }
 0x3f7   : > { %1053 = vmatpush.bf16.xpose.msrb.mxu2 %v1041_v28 }
 0x3f9   : > { %v947_v29 = vpop.f32.mrf.mxu3 }
 0x3fa   : > { %v956_v30 = vsel %vm794_vm13, %v947_v29, -1e+30 }
 0x3fb   : > { %v959_v31 = vsel %vm849_vm14, %v956_v30, -inf }
 0x3fc   : > { %960 = vmax.xlane.f32.xlu1 %v959_v31 }
 0x3fd   : > { %v1141_v32 = vpop.permute.xlu1 %1140  ;;  %v1139_v36 = vpop.permute.xlu2 %1138 }
 0x3fe   : > { %v1152_v33 = vsel %vm815_vm11, %v1141_v32, 0  ;;  %v1149_v38 = vsel %vm815_vm11, %v1139_v36, 0 }
 0x3ff   : > { %1160 = vmatpush.bf16.xpose.msrb.mxu3 %v1152_v33 }
 0x401   : > { %v949_v34 = vpop.f32.mrf.mxu3 }
 0x402   : > { %v957_v35 = vsel %vm794_vm13, %v949_v34, -1e+30 }
 0x403   : > { %v962_v37 = vsel %vm849_vm14, %v957_v35, -inf }
 0x404   : > { %963 = vmax.xlane.f32.xlu2 %v962_v37 }
 0x405   : > { %v1135_v39 = vpop.permute.xlu1 %1134  ;;  %v1027_v40 = vpop.permute.xlu2 %1026 }
 0x407   : > { %1161 = vmatpush.bf16.xpose.msrb.mxu3 %v1149_v38 }
 0x40d   : > { %v1137_v41 = vpop.permute.xlu2 %1136 }
 0x40e   : > { %2323 = vmatmul.msk.bf16.vlgmr.msrb.gmra.mxu3 %vm815_vm11, %v1135_v39 }
 0x41e   : > { %2324 = vmatmul.msk.bf16.gmra.mxu3 %vm815_vm11, %v1137_v41 }
 0x426   : > { %v876_v42 = vpop.xlane.xlu0 %875 }
 0x427   : > { %2667 = vrcp.f32 %v876_v42 }
 0x42d   : > { %v2668_v43 = vpop.eup %2667 }
 0x42e   : > { %v882_v44 = vmul.f32 %v2668_v43, %v2662_v13 }
 0x430   : > { %v884_v45 = vpack.c.bf16 %v882_v44, %v882_v44 }
 0x432   : > { %2314 = vmatmul.msk.bf16.gmra.mxu2 %vm849_vm14, %v884_v45 }
 0x439   : > { %v1029_v47 = vpop.permute.xlu0 %1028 }
 0x442   : > { %2319 = vmatmul.msk.bf16.vlgmr.msrb.gmra.mxu2 %vm815_vm11, %v1027_v40 }
 0x452   : > { %2320 = vmatmul.msk.bf16.gmra.mxu2 %vm815_vm11, %v1029_v47 }
 0x46f   : > { %v961_v48 = vpop.xlane.xlu1 %960 }
 0x470   : > { %v968_v49 = vsub.f32 %v956_v30, %v961_v48 }
 0x471   : > { %v952_v50 = vpop.f32.mrf.mxu3 }
 0x472   : > { %v971_v51 = vmul.f32 1.442695, %v968_v49  ;;  %v958_v52 = vsel %vm794_vm13, %v952_v50, -1e+30 }
 0x473   : > { %v965_v53 = vsel %vm849_vm14, %v958_v52, -inf }
 0x474   : > { %2669 = vpow2.f32 %v971_v51  ;;  %966 = vmax.xlane.f32.xlu0 %v965_v53  ;;  %v3309_v8 = vpop.f32.mrf.mxu2 }
 0x477   : > { %v964_v57 = vpop.xlane.xlu2 %963 }
 0x478   : > { %v969_v58 = vsub.f32 %v957_v35, %v964_v57 }
 0x479   : > { %v954_v54 = vpop.f32.mrf.mxu3 }
 0x47a   : > { %v3293_v55 = vpop.eup %2669  ;;  %v973_v59 = vmul.f32 1.442695, %v969_v58 }
 0x47b   : > { %v977_v56 = vsel %vm849_vm14, %v3293_v55, 0.0 }
 0x47c   : > { %978 = vadd.xlane.f32.xlu0 %v977_v56  ;;  %2671 = vpow2.f32 %v973_v59  ;;  %v3311_v10 = vpop.f32.mrf.mxu2 }
 0x482   : > { %v3302_v63 = vpop.eup %2671 }
 0x483   : > { %v980_v6 = vsel %vm849_vm14, %v3302_v63, 0.0 }
 0x490   : > { %994 = vrot.lane.b32.xlu0 %v3222_v19, %s2968_s28 }
 0x491   : > { %v1163_v60 = vpop.f32.mrf.mxu3 }
 0x492   : > { %v1172_v61 = vsel %vm794_vm13, %v1163_v60, -1e+30 }
 0x493   : > { %v1175_v62 = vsel %vm849_vm14, %v1172_v61, -inf }
 0x494   : > { %1176 = vmax.xlane.f32.xlu1 %v1175_v62 }
 0x499   : > { %v1165_v2 = vpop.f32.mrf.mxu3 }
 0x49a   : > { %v1173_v3 = vsel %vm794_vm13, %v1165_v2, -1e+30 }
 0x49b   : > { %v1178_v5 = vsel %vm849_vm14, %v1173_v3, -inf }
 0x49c   : > { %1179 = vmax.xlane.f32.xlu2 %v1178_v5  ;;  %981 = vadd.xlane.f32.xlu1 %v980_v6 }
 0x4a1   : > { %v1168_v7 = vpop.f32.mrf.mxu3 }
 0x4a2   : > { %v1174_v29 = vsel %vm794_vm13, %v1168_v7, -1e+30 }
 0x4a3   : > { %v1181_v30 = vsel %vm849_vm14, %v1174_v29, -inf }
 0x4a9   : > { %v1170_v9 = vpop.f32.mrf.mxu3 }
 0x4b5   : > { %v3313_v11 = vpop.f32.mrf.mxu2 }
 0x4bd   : > { %v916_v13 = vpop.f32.mrf.mxu2 }
 0x4c5   : > { %v1055_v14 = vpop.f32.mrf.mxu2 }
 0x4c6   : > { %v1064_v15 = vsel %vm794_vm13, %v1055_v14, -1e+30 }
 0x4c7   : > { %v1067_v16 = vsel %vm849_vm14, %v1064_v15, -inf }
 0x4c8   : > { %1068 = vmax.xlane.f32.xlu1 %v1067_v16 }
 0x4cd   : > { %v1057_v17 = vpop.f32.mrf.mxu2 }
 0x4ce   : > { %v1065_v18 = vsel %vm794_vm13, %v1057_v17, -1e+30 }
 0x4cf   : > { %v1070_v20 = vsel %vm849_vm14, %v1065_v18, -inf }
 0x4d0   : > { %1071 = vmax.xlane.f32.xlu2 %v1070_v20 }
 0x4d5   : > { %v1060_v21 = vpop.f32.mrf.mxu2 }
 0x4d6   : > { %v1066_v2 = vsel %vm794_vm13, %v1060_v21, -1e+30 }
 0x4dd   : > { %v1062_v22 = vpop.f32.mrf.mxu2 }
 0x4e7   : > { %v967_v24 = vpop.xlane.xlu0 %966 }
 0x4e8   : > { %v970_v25 = vsub.f32 %v958_v52, %v967_v24  ;;  %996 = vrot.lane.b32.xlu2 %v3226_v23, %s2968_s28 }
 0x4ea   : > { %v975_v26 = vmul.f32 1.442695, %v970_v25 }
 0x4ec   : > { %2673 = vpow2.f32 %v975_v26 }
 0x4ef   : > { %v979_v47 = vpop.xlane.xlu0 %978 }
 0x4f2   : > { %v2674_v27 = vpop.eup %2673 }
 0x4f3   : > { %v983_v28 = vsel %vm849_vm14, %v2674_v27, 0.0 }
 0x4f4   : > { %984 = vadd.xlane.f32.xlu1 %v983_v28 }
 0x4fc   : > { %1182 = vmax.xlane.f32.xlu1 %v1181_v30 }
 0x507   : > { %v1177_v31 = vpop.xlane.xlu1 %1176 }
 0x508   : > { %v1184_v32 = vsub.f32 %v1172_v61, %v1177_v31  ;;  %v995_v61 = vpop.permute.xlu0 %994 }
 0x50a   : > { %v1187_v33 = vmul.f32 1.442695, %v1184_v32 }
 0x50c   : > { %2675 = vpow2.f32 %v1187_v33 }
 0x50f   : > { %v1180_v34 = vpop.xlane.xlu2 %1179  ;;  %v982_v41 = vpop.xlane.xlu1 %981 }
 0x510   : > { %v1185_v35 = vsub.f32 %v1173_v3, %v1180_v34  ;;  %v1073_v3 = vsel %vm849_vm14, %v1066_v2, -inf }
 0x512   : > { %v3327_v36 = vpop.eup %2675  ;;  %v1189_v37 = vmul.f32 1.442695, %v1185_v35 }
 0x513   : > { %v1193_v38 = vsel %vm849_vm14, %v3327_v36, 0.0 }
 0x514   : > { %2677 = vpow2.f32 %v1189_v37  ;;  %1194 = vadd.xlane.f32.xlu1 %v1193_v38 }
 0x51a   : > { %v2678_v39 = vpop.eup %2677 }
 0x51b   : > { %v1196_v40 = vsel %vm849_vm14, %v2678_v39, 0.0 }
 0x51c   : > { %1197 = vadd.xlane.f32.xlu1 %v1196_v40 }
 0x535   : > { %1104 = vrot.lane.b32.xlu1 %v3226_v23, %s2969_s30 }
 0x53b   : > { %v1069_v42 = vpop.xlane.xlu1 %1068 }
 0x53c   : > { %v1076_v43 = vsub.f32 %v1064_v15, %v1069_v42 }
 0x53e   : > { %v1079_v44 = vmul.f32 1.442695, %v1076_v43 }
 0x540   : > { %2679 = vpow2.f32 %v1079_v44 }
 0x541   : > { %2681 = vrcp.f32 %v982_v41 }
 0x542   : > { %2683 = vrcp.f32 %v979_v47 }
 0x543   : > { %v1072_v45 = vpop.xlane.xlu2 %1071 }
 0x544   : > { %v1077_v48 = vsub.f32 %v1065_v18, %v1072_v45 }
 0x546   : > { %v2680_v49 = vpop.eup %2679  ;;  %v1081_v50 = vmul.f32 1.442695, %v1077_v48 }
 0x547   : > { %v1085_v51 = vsel %vm849_vm14, %v2680_v49, 0.0  ;;  %v2682_v52 = vpop.eup %2681 }
 0x548   : > { %2685 = vpow2.f32 %v1081_v50  ;;  %1086 = vadd.xlane.f32.xlu0 %v1085_v51  ;;  %v2684_v56 = vpop.eup %2683  ;;  %v990_v58 = vmul.f32 %v2682_v52, %v3302_v63 }
 0x549   : > { %v989_v60 = vmul.f32 %v2684_v56, %v3293_v55 }
 0x54b   : > { %v997_v53 = vpop.permute.xlu2 %996  ;;  %v992_v62 = vpack.c.bf16 %v990_v58, %v989_v60 }
 0x54c   : > { %v1006_v54 = vsel %vm896_vm12, %v997_v53, 0 }
 0x54d   : > { %1014 = vmatpush.bf16.msrb.mxu0 %v1006_v54 }
 0x54e   : > { %v2686_v57 = vpop.eup %2685 }
 0x54f   : > { %v1088_v59 = vsel %vm849_vm14, %v2686_v57, 0.0 }
 0x550   : > { %1089 = vadd.xlane.f32.xlu2 %v1088_v59 }
 0x551   : > { %1015 = vmatpush.bf16.msrb.mxu0 %v995_v61 }
 0x554   : > { %2317 = vmatmul.msk.bf16.vlgmr.msrb.gmra.mxu0 %vm849_vm14, %v992_v62 }
 0x55c   : > { %1212 = vrot.lane.b32.xlu0 %v3226_v23, %s2970_s22 }
 0x55f   : > { %1074 = vmax.xlane.f32.xlu1 %v1073_v3  ;;  %v2459_v3 = vld [vmem:[%s3661_s4] sm:$0xff] }
 0x567   : > { %v985_v63 = vpop.xlane.xlu1 %984 }
 0x568   : > { %2687 = vrcp.f32 %v985_v63  ;;  %1102 = vrot.lane.b32.xlu2 %v3222_v19, %s2969_s30 }
 0x56e   : > { %v2688_v55 = vpop.eup %2687 }
 0x56f   : > { %v991_v5 = vmul.f32 %v2688_v55, %v2674_v27  ;;  %v1183_v6 = vpop.xlane.xlu1 %1182 }
 0x570   : > { %v1186_v9 = vsub.f32 %v1174_v29, %v1183_v6 }
 0x571   : > { %v993_v7 = vpack.c.bf16 %v991_v5, %v991_v5 }
 0x572   : > { %v1191_v46 = vmul.f32 1.442695, %v1186_v9 }
 0x573   : > { %2318 = vmatmul.msk.bf16.gmra.mxu0 %vm849_vm14, %v993_v7 }
 0x574   : > { %2689 = vpow2.f32 %v1191_v46 }
 0x578   : > { %1210 = vrot.lane.b32.xlu1 %v3222_v19, %s2970_s22 }
 0x57a   : > { %v2690_v23 = vpop.eup %2689 }
 0x57b   : > { %v1199_v13 = vsel %vm849_vm14, %v2690_v23, 0.0 }
 0x586   : > { %1200 = vadd.xlane.f32.xlu0 %v1199_v13 }
 0x587   : > { %v1195_v14 = vpop.xlane.xlu1 %1194 }
 0x588   : > { %2691 = vrcp.f32 %v1195_v14 }
 0x58e   : > { %v2692_v16 = vpop.eup %2691 }
 0x58f   : > { %v1198_v15 = vpop.xlane.xlu1 %1197  ;;  %v1205_v18 = vmul.f32 %v2692_v16, %v3327_v36 }
 0x590   : > { %2693 = vrcp.f32 %v1198_v15 }
 0x596   : > { %v2694_v17 = vpop.eup %2693 }
 0x597   : > { %v1206_v20 = vmul.f32 %v2694_v17, %v2678_v39 }
 0x599   : > { %v1208_v21 = vpack.c.bf16 %v1206_v20, %v1205_v18 }
 0x5a7   : > { %v1105_v22 = vpop.permute.xlu1 %1104 }
 0x5a8   : > { %v1114_v24 = vsel %vm896_vm12, %v1105_v22, 0 }
 0x5a9   : > { %1122 = vmatpush.bf16.msrb.mxu1 %v1114_v24 }
 0x5bb   : > { %v1087_v19 = vpop.xlane.xlu0 %1086 }
 0x5bc   : > { %2695 = vrcp.f32 %v1087_v19 }
 0x5c2   : > { %v2696_v26 = vpop.eup %2695 }
 0x5c3   : > { %v1090_v25 = vpop.xlane.xlu2 %1089  ;;  %v1097_v28 = vmul.f32 %v2696_v26, %v2680_v49 }
 0x5c4   : > { %2697 = vrcp.f32 %v1090_v25 }
 0x5ca   : > { %v2698_v27 = vpop.eup %2697 }
 0x5cb   : > { %v1098_v29 = vmul.f32 %v2698_v27, %v2686_v57  ;;  %v1103_v30 = vpop.permute.xlu2 %1102 }
 0x5cc   : > { %1123 = vmatpush.bf16.msrb.mxu1 %v1103_v30 }
 0x5cd   : > { %v1100_v31 = vpack.c.bf16 %v1098_v29, %v1097_v28  ;;  %v2641_v29 = vld [vmem:[%s3662_s5] ss:$0 sm:$0xff] }
 0x5ce   : > { %v1213_v32 = vpop.permute.xlu0 %1212 }
 0x5cf   : > { %v1222_v33 = vsel %vm896_vm12, %v1213_v32, 0  ;;  %2321 = vmatmul.msk.bf16.vlgmr.msrb.gmra.mxu1 %vm849_vm14, %v1100_v31 }
 0x5d0   : > { %1230 = vmatpush.bf16.msra.mxu0 %v1222_v33 }
 0x5d1   : > { %v1017_v34 = vpop.f32.mrf.mxu0 }
 0x5d2   : > { %v1075_v35 = vpop.xlane.xlu1 %1074 }
 0x5d3   : > { %v1078_v36 = vsub.f32 %v1066_v2, %v1075_v35  ;;  %v2460_v2 = vld [vmem:[%s3661_s4 + $0x8] sm:$0xff] }
 0x5d4   : > { %1318 = vmatpush.bf16.msra.mxu2 %v2460_v2 }
 0x5d5   : > { %v1083_v37 = vmul.f32 1.442695, %v1078_v36 }
 0x5d7   : > { %2699 = vpow2.f32 %v1083_v37 }
 0x5d8   : > { %1319 = vmatpush.bf16.msra.mxu2 %v2459_v3 }
 0x5d9   : > { %v1019_v38 = vpop.f32.mrf.mxu0 }
 0x5da   : > { %v2606_v39 = vpack.i.bf16 %v1019_v38, %v1017_v34 }
 0x5dc   : > { %2607 = vrot.lane.b32.xlu2 %v2606_v39, %s2971_s2 }
 0x5dd   : > { %v2700_v40 = vpop.eup %2699 }
 0x5de   : > { %v1091_v41 = vsel %vm849_vm14, %v2700_v40, 0.0 }
 0x5df   : > { %1092 = vadd.xlane.f32.xlu1 %v1091_v41 }
 0x5ea   : > { %v1211_v42 = vpop.permute.xlu1 %1210 }
 0x5eb   : > { %1231 = vmatpush.bf16.msra.mxu0 %v1211_v42 }
 0x5ee   : > { %2325 = vmatmul.msk.bf16.vlgmr.msra.gmra.mxu0 %vm849_vm14, %v1208_v21 }
 0x5f0   : > { %v1022_v43 = vpop.f32.mrf.mxu0 }
 0x5f8   : > { %v1024_v44 = vpop.f32.mrf.mxu0 }
 0x5f9   : > { %v1201_v45 = vpop.xlane.xlu0 %1200 }
 0x5fa   : > { %2701 = vrcp.f32 %v1201_v45 }
 0x600   : > { %v2702_v47 = vpop.eup %2701 }
 0x601   : > { %v1207_v48 = vmul.f32 %v2702_v47, %v2690_v23 }
 0x603   : > { %v1209_v49 = vpack.c.bf16 %v1207_v48, %v1207_v48 }
 0x605   : > { %2326 = vmatmul.msk.bf16.gmra.mxu0 %vm849_vm14, %v1209_v49 }
 0x636   : > { %v2608_v63 = vpop.permute.xlu2 %2607 }
 0x637   : > { %v2610_v5 = vunpack.i.h.bf16 %v2608_v63  ;;  %v2609_v6 = vunpack.i.l.bf16 %v2608_v63 }
 0x639   : > { %v1279_v23 = vsel %vm815_vm11, %v3311_v10, %v2610_v5  ;;  %v1278_v13 = vsel %vm815_vm11, %v3309_v8, %v2609_v6 }
 0x64c   : > { %v1125_v50 = vpop.f32.mrf.mxu1 }
 0x652   : > { %v1093_v51 = vpop.xlane.xlu1 %1092 }
 0x653   : > { %2703 = vrcp.f32 %v1093_v51 }
 0x654   : > { %v1127_v52 = vpop.f32.mrf.mxu1 }
 0x655   : > { %v2611_v53 = vpack.i.bf16 %v1127_v52, %v1125_v50  ;;  %v2462_v50 = vld [vmem:[#allocation5 + $0x8] sm:$0xff] }
 0x656   : > { %1454 = vmatpush.bf16.msra.mxu1 %v2462_v50 }
 0x657   : > { %2612 = vrot.lane.b32.xlu2 %v2611_v53, %s2972_s24  ;;  %v2461_v53 = vld [vmem:[#allocation5] sm:$0xff] }
 0x659   : > { %v2704_v54 = vpop.eup %2703 }
 0x65a   : > { %v1099_v56 = vmul.f32 %v2704_v54, %v2700_v40  ;;  %1455 = vmatpush.bf16.msra.mxu1 %v2461_v53 }
 0x65c   : > { %v1101_v57 = vpack.c.bf16 %v1099_v56, %v1099_v56 }
 0x65e   : > { %2322 = vmatmul.msk.bf16.gmra.mxu1 %vm849_vm14, %v1101_v57 }
 0x66b   : > { %v1233_v58 = vpop.f32.mrf.mxu0 }
 0x673   : > { %v1235_v59 = vpop.f32.mrf.mxu0 }
 0x674   : > { %v2616_v60 = vpack.i.bf16 %v1235_v59, %v1233_v58 }
 0x676   : > { %2617 = vrot.lane.b32.xlu2 %v2616_v60, %s2973_s21 }
 0x67e   : > { %1249 = vrot.lane.b32.xlu2 %v1022_v43, %s2971_s2 }
 0x682   : > { %v1238_v61 = vpop.f32.mrf.mxu0 }
 0x686   : > { %1273 = vrot.lane.b32.xlu2 %v1238_v61, %s2973_s21 }
 0x68a   : > { %v1240_v62 = vpop.f32.mrf.mxu0 }
 0x6b1   : > { %v2613_v55 = vpop.permute.xlu2 %2612 }
 0x6b2   : > { %v2615_v7 = vunpack.i.h.bf16 %v2613_v55  ;;  %v2614_v9 = vunpack.i.l.bf16 %v2613_v55 }
 0x6b4   : > { %v1282_v16 = vsel %vm1281_vm15, %v1278_v13, %v2614_v9  ;;  %v1283_v17 = vsel %vm1281_vm15, %v1279_v23, %v2615_v7 }
 0x6d0   : > { %v2618_v46 = vpop.permute.xlu2 %2617 }
 0x6d1   : > { %v2620_v14 = vunpack.i.h.bf16 %v2618_v46  ;;  %v2619_v15 = vunpack.i.l.bf16 %v2618_v46 }
 0x6d3   : > { %v1286_v18 = vsel %vm849_vm14, %v1283_v17, %v2620_v14  ;;  %v1285_v20 = vsel %vm849_vm14, %v1282_v16, %v2619_v15  ;;  %v2642_v15 = vld [vmem:[%s3663_s6] ss:$0 sm:$0xff] }
 0x6d4   : > { %v1288_v21 = vpack.c.bf16 %v1286_v18, %v1285_v20 }
 0x6d6   : > { %2335 = vmatmul.msk.bf16.vlgmr.msra.gmra.mxu2 %vm655_vm0, %v1288_v21  ;;  %v2643_v21 = vld [vmem:[%s3664_s7] ss:$0 sm:$0xff] }
 0x6d8   : > { %v1250_v24 = vpop.permute.xlu2 %1249 }
 0x6d9   : > { %v1280_v8 = vsel %vm815_vm11, %v3313_v11, %v1250_v24 }
 0x6db   : > { %v1130_v22 = vpop.f32.mrf.mxu1 }
 0x6dc   : > { %1261 = vrot.lane.b32.xlu1 %v1130_v22, %s2972_s24  ;;  %s3712_s24 = sld [smem:[#allocation31_spill]] }
 0x6e0   : > { %v1274_v25 = vpop.permute.xlu2 %1273 }
 0x6e2   : > { %s2139_s21 = scalar_lea.hbm %s3712_s24, %s2489_s27 }
 0x6e3   : > { %v1132_v10 = vpop.f32.mrf.mxu1  ;;  %s2142_s20 = sshll.u32 %s2139_s21, 4  ;;  %s2143_s20 = int_to_ptr.hbm [resolvable:$true] %s2142_s20 }
 0x74e   : > { %v1262_v19 = vpop.permute.xlu1 %1261 }
 0x74f   : > { %v1284_v26 = vsel %vm1281_vm15, %v1280_v8, %v1262_v19 }
 0x750   : > { %v1287_v27 = vsel %vm849_vm14, %v1284_v26, %v1274_v25 }
 0x751   : > { %v1289_v28 = vpack.c.bf16 %v1287_v27, %v1287_v27 }
 0x753   : > { %2336 = vmatmul.msk.bf16.gmra.mxu2 %vm655_vm0, %v1289_v28 }
 0x759   : > { %v1321_v30 = vpop.f32.mrf.mxu2 }
 0x75a   : > { %v1330_v31 = vadd.f32 %v1321_v30, %v3180_v0 }
 0x75c   : > { %v3385_v32 = vadd.f32 %v2641_v29, %v1330_v31 }
 0x75e   : > { %v1342_v11 = vsel %vm655_vm0, %v3385_v32, 0.0 }
 0x75f   : > { %1343 = vadd.xlane.f32.xlu0 %v1342_v11 }
 0x761   : > { %v1323_v33 = vpop.f32.mrf.mxu2 }
 0x762   : > { %v1331_v34 = vadd.f32 %v1323_v33, %v3188_v4  ;;  %v2469_v33 = vld [vmem:[%s3667_s10 + $0x30] sm:$0xff] }
 0x764   : > { %v3390_v35 = vadd.f32 %v2641_v29, %v1331_v34 }
 0x766   : > { %v1345_v36 = vsel %vm655_vm0, %v3390_v35, 0.0 }
 0x767   : > { %1346 = vadd.xlane.f32.xlu2 %v1345_v36 }
 0x7d2   : > { %v1344_v37 = vpop.xlane.xlu0 %1343 }
 0x7d3   : > { %v1351_v39 = vmul.f32 %v1344_v37, %v3192_v12  ;;  %v2468_v37 = vld [vmem:[%s3667_s10 + $0x28] sm:$0xff] }
 0x7d5   : > { %v1354_v42 = vsub.f32 %v3385_v32, %v1351_v39 }
 0x7d6   : > { %v1326_v38 = vpop.f32.mrf.mxu2 }
 0x7d7   : > { %v1332_v0 = vadd.f32 %v1326_v38, %v3182_v1  ;;  %v1357_v48 = vmul.f32 %v1354_v42, %v1354_v42 }
 0x7d9   : > { %v3396_v40 = vadd.f32 %v2641_v29, %v1332_v0  ;;  %v1360_v1 = vsel %vm655_vm0, %v1357_v48, 0.0  ;;  %v2470_v29 = vld [vmem:[%s3667_s10 + $0x38] sm:$0xff]  ;;  %v2467_v0 = vld [vmem:[%s3667_s10 + $0x20] sm:$0xff] }
 0x7da   : > { %v1347_v41 = vpop.xlane.xlu2 %1346  ;;  %1563 = vmatpush.bf16.msra.mxu3 %v2470_v29  ;;  %v2463_v48 = vld [vmem:[%s3667_s10] sm:$0xff] }
 0x7db   : > { %v1352_v43 = vmul.f32 %v1347_v41, %v3192_v12  ;;  %v1348_v4 = vsel %vm655_vm0, %v3396_v40, 0.0 }
 0x7dc   : > { %1349 = vadd.xlane.f32.xlu0 %v1348_v4 }
 0x7dd   : > { %v1355_v44 = vsub.f32 %v3390_v35, %v1352_v43  ;;  %v2466_v43 = vld [vmem:[%s3667_s10 + $0x18] sm:$0xff] }
 0x7de   : > { %v1328_v45 = vpop.f32.mrf.mxu2  ;;  %1564 = vmatpush.bf16.msra.mxu3 %v2469_v33 }
 0x7df   : > { %v1358_v47 = vmul.f32 %v1355_v44, %v1355_v44 }
 0x7e1   : > { %v1363_v49 = vsel %vm655_vm0, %v1358_v47, 0.0  ;;  %v2464_v47 = vld [vmem:[%s3667_s10 + $0x8] sm:$0xff] }
 0x7e2   : > { %1364 = vadd.xlane.f32.xlu1 %v1363_v49  ;;  %1565 = vmatpush.bf16.msra.mxu3 %v2468_v37  ;;  %v2644_v49 = vld [vmem:[%s3666_s9] ss:$0 sm:$0xff]  ;;  %v2975_v37 = vmov 6  }
 0x7e3   : > { %2623 = vset.pattern.permute.xlu0 %v2975_v37 }
 0x7e4   : > { %1361 = vadd.xlane.f32.xlu0 %v1360_v1 }
 0x7e6   : > { %1566 = vmatpush.bf16.msra.mxu3 %v2467_v0 }
 0x7ea   : > { %1567 = vmatpush.bf16.msra.mxu3 %v2466_v43  ;;  %v2976_v43 = vmov 7  }
 0x84f   : > { %v1350_v51 = vpop.xlane.xlu0 %1349 }
 0x850   : > { %v1353_v52 = vmul.f32 %v1350_v51, %v3192_v12 }
 0x852   : > { %v3407_v54 = vsub.f32 %v3396_v40, %v1353_v52 }
 0x854   : > { %v1359_v56 = vmul.f32 %v3407_v54, %v3407_v54 }
 0x855   : > { %v1365_v57 = vpop.xlane.xlu1 %1364 }
 0x856   : > { %v1370_v58 = vmul.f32 %v1365_v57, %v3192_v12  ;;  %v1366_v59 = vsel %vm655_vm0, %v1359_v56, 0.0 }
 0x857   : > { %1367 = vadd.xlane.f32.xlu0 %v1366_v59  ;;  %v1362_v60 = vpop.xlane.xlu0 %1361 }
 0x858   : > { %v1373_v61 = vadd.f32 1e-05, %v1370_v58  ;;  %v1369_v62 = vmul.f32 %v1362_v60, %v3192_v12 }
 0x85a   : > { %2705 = vrsqrt.f32 %v1373_v61  ;;  %v1372_v2 = vadd.f32 1e-05, %v1369_v62  ;;  %vm1391_vm2 = vweird.f32 %v1373_v61 }
 0x85c   : > { %2707 = vrsqrt.f32 %v1372_v2  ;;  %vm1381_vm5 = vweird.f32 %v1372_v2 }
 0x860   : > { %v2706_v3 = vpop.eup %2705 }
 0x861   : > { %v1386_v63 = vmul.f32 %v2706_v3, %v1373_v61  ;;  %vm1392_vm1 = vweird.f32 %v2706_v3 }
 0x862   : > { %v2708_v55 = vpop.eup %2707  ;;  %vm1393_vm4 = vmor %vm1391_vm2, %vm1392_vm1  ;;  %vm1737_vm2 = vcmask 1040384  }
 0x863   : > { %v1387_v5 = vmul.f32 %v2706_v3, %v1386_v63  ;;  %v1376_v6 = vmul.f32 %v2708_v55, %v1372_v2  ;;  %vm1382_vm3 = vweird.f32 %v2708_v55 }
 0x864   : > { %vm1383_vm6 = vmor %vm1381_vm5, %vm1382_vm3  ;;  %vm1769_vm3 = vcmask 1045504  }
 0x865   : > { %v1388_v7 = vmul.f32 0.5, %v1387_v5  ;;  %v1377_v9 = vmul.f32 %v2708_v55, %v1376_v6 }
 0x867   : > { %v1389_v46 = vsub.f32 1.5, %v1388_v7  ;;  %v1378_v23 = vmul.f32 0.5, %v1377_v9 }
 0x869   : > { %v1390_v13 = vmul.f32 %v2706_v3, %v1389_v46  ;;  %v1379_v14 = vsub.f32 1.5, %v1378_v23 }
 0x86b   : > { %v1394_v16 = vsel %vm1393_vm4, %v2706_v3, %v1390_v13  ;;  %v1380_v17 = vmul.f32 %v2708_v55, %v1379_v14  ;;  %v3451_v13 = vld [vmem:[#allocation7] sm:$0xff]  ;;  %v2974_v14 = vmov 5  }
 0x86c   : > { %v1406_v18 = vmul.f32 %v1394_v16, %v1355_v44  ;;  %v2465_v44 = vld [vmem:[%s3667_s10 + $0x10] sm:$0xff]  ;;  %2621 = vset.pattern.permute.xlu2 %v2974_v14  ;;  %2622 = vset.pattern.permute.xlu1 %v2974_v14 }
 0x86d   : > { %v1384_v20 = vsel %vm1383_vm6, %v2708_v55, %v1380_v17  ;;  %1568 = vmatpush.bf16.msra.mxu3 %v2465_v44  ;;  %1781 = vperm.xlu2 %2621, %v3451_v13   ;;  %v2978_v44 = vmov 1   ;;  %vm1693_vm6 = vcmask 1042432  }
 0x86e   : > { %v1412_v22 = vmul.f32 %v2642_v15, %v1406_v18  ;;  %v1405_v10 = vmul.f32 %v1384_v20, %v1354_v42 }
 0x870   : > { %v1411_v24 = vmul.f32 %v2642_v15, %v1405_v10  ;;  %v1418_v8 = vadd.f32 %v2643_v21, %v1412_v22 }
 0x871   : > { %1569 = vmatpush.bf16.msra.mxu3 %v2464_v47 }
 0x872   : > { %v1417_v19 = vadd.f32 %v2643_v21, %v1411_v24 }
 0x874   : > { %v1420_v25 = vpack.c.bf16 %v1418_v8, %v1417_v19 }
 0x875   : > { %1570 = vmatpush.bf16.msra.mxu3 %v2463_v48  ;;  %2624 = vset.pattern.permute.xlu2 %v2975_v37 }
 0x876   : > { %2345 = vmatmul.msk.bf16.vlgmr.msra.gmra.mxu1 %vm655_vm0, %v1420_v25 }
 0x8ca   : > { %v1368_v26 = vpop.xlane.xlu0 %1367 }
 0x8cb   : > { %v1371_v27 = vmul.f32 %v1368_v26, %v3192_v12 }
 0x8cd   : > { %v1374_v28 = vadd.f32 1e-05, %v1371_v27  ;;  %v2645_v27 = vld [vmem:[%s3668_s11] ss:$0 sm:$0xff] }
 0x8cf   : > { %2709 = vrsqrt.f32 %v1374_v28  ;;  %vm1401_vm8 = vweird.f32 %v1374_v28 }
 0x8d5   : > { %v2710_v30 = vpop.eup %2709 }
 0x8d6   : > { %v1396_v31 = vmul.f32 %v2710_v30, %v1374_v28  ;;  %vm1402_vm7 = vweird.f32 %v2710_v30 }
 0x8d7   : > { %vm1403_vm9 = vmor %vm1401_vm8, %vm1402_vm7  ;;  %vm1715_vm8 = vcmask 1041408  }
 0x8d8   : > { %v1397_v11 = vmul.f32 %v2710_v30, %v1396_v31 }
 0x8da   : > { %v1398_v34 = vmul.f32 0.5, %v1397_v11 }
 0x8dc   : > { %v1399_v36 = vsub.f32 1.5, %v1398_v34 }
 0x8de   : > { %v1400_v38 = vmul.f32 %v2710_v30, %v1399_v36 }
 0x8e0   : > { %v1404_v39 = vsel %vm1403_vm9, %v2710_v30, %v1400_v38  ;;  %vm1675_vm9 = vcmask 1044480  }
 0x8e1   : > { %v1407_v41 = vmul.f32 %v1404_v39, %v3407_v54 }
 0x8e3   : > { %v1413_v42 = vmul.f32 %v2642_v15, %v1407_v41 }
 0x8e5   : > { %v1419_v4 = vadd.f32 %v2643_v21, %v1413_v42  ;;  %v1678_v42 = vld [vmem:[#allocation7 + $0x8] sm:$0xff] }
 0x8e6   : > { %1785 = vperm.xlu1 %2622, %v1678_v42  }
 0x8e7   : > { %v1421_v45 = vpack.c.bf16 %v1419_v4, %v1419_v4  ;;  %v2977_v4 = vmov 2  }
 0x8e9   : > { %2346 = vmatmul.msk.bf16.gmra.mxu1 %vm655_vm0, %v1421_v45 }
 0x8ee   : > { %2625 = vset.pattern.permute.xlu1 %v2976_v43 }
 0x8ef   : > { %1805 = vperm.xlu1 %2625, %v3451_v13  }
 0x8f3   : > { %v1457_v1 = vpop.f32.mrf.mxu1 }
 0x8f4   : > { %v1458_v50 = vadd.f32 %v2644_v49, %v1457_v1 }
 0x8f6   : > { %v1469_v51 = vmul.f32 0.044715, %v1458_v50  ;;  %v1466_v5 = vmul.f32 0.5, %v1458_v50 }
 0x8f7   : > { %2627 = vset.pattern.permute.xlu1 %v2978_v44 }
 0x8f8   : > { %v1472_v52 = vmul.f32 %v1469_v51, %v1458_v50  ;;  %1704 = vperm.xlu1 %2627, %v3451_v13  }
 0x8fa   : > { %v1475_v53 = vmul.f32 %v1472_v52, %v1458_v50 }
 0x8fb   : > { %v1459_v54 = vpop.f32.mrf.mxu1 }
 0x8fc   : > { %v1478_v56 = vadd.f32 %v1475_v53, %v1458_v50  ;;  %v1460_v57 = vadd.f32 %v2644_v49, %v1459_v54  ;;  %v2979_v50 = vmov 3  }
 0x8fe   : > { %v1470_v58 = vmul.f32 0.044715, %v1460_v57  ;;  %v1481_v59 = vmul.f32 0.7978846, %v1478_v56  ;;  %v1467_v6 = vmul.f32 0.5, %v1460_v57  ;;  %v2980_v56 = vmov 4  }
 0x900   : > { %v1473_v60 = vmul.f32 %v1470_v58, %v1460_v57  ;;  %2711 = vtanh.f32 %v1481_v59  ;;  %2629 = vset.pattern.permute.xlu1 %v2977_v4  ;;  %v2982_v58 = vmov 8  }
 0x901   : > { %1726 = vperm.xlu1 %2629, %v3451_v13  }
 0x902   : > { %v1476_v61 = vmul.f32 %v1473_v60, %v1460_v57 }
 0x904   : > { %v1479_v62 = vadd.f32 %v1476_v61, %v1460_v57  ;;  %v2981_v57 = vmov 0  }
 0x906   : > { %v1482_v2 = vmul.f32 0.7978846, %v1479_v62  ;;  %v2712_v3 = vpop.eup %2711 }
 0x907   : > { %v1487_v63 = vadd.f32 1.0, %v2712_v3 }
 0x908   : > { %2713 = vtanh.f32 %v1482_v2 }
 0x909   : > { %v1490_v9 = vmul.f32 %v1487_v63, %v1466_v5  ;;  %2632 = vset.pattern.permute.xlu1 %v2979_v50 }
 0x90a   : > { %1744 = vperm.xlu1 %2632, %v1678_v42  }
 0x90e   : > { %v2714_v55 = vpop.eup %2713 }
 0x90f   : > { %v1488_v7 = vadd.f32 1.0, %v2714_v55 }
 0x911   : > { %v1491_v46 = vmul.f32 %v1488_v7, %v1467_v6 }
 0x912   : > { %2634 = vset.pattern.permute.xlu1 %v2980_v56 }
 0x913   : > { %v1493_v23 = vpack.c.bf16 %v1491_v46, %v1490_v9  ;;  %1755 = vperm.xlu1 %2634, %v1678_v42  }
 0x915   : > { %1571 = vmatmul.bf16.vlgmr.msra.gmra.mxu3 %v1493_v23 }
 0x958   : > { %v3495_v7 = vpop.permute.xlu1 %1785 }
 0x961   : > { %v3499_v14 = vpop.permute.xlu1 %1805 }
 0x966   : > { %v1462_v15 = vpop.f32.mrf.mxu1 }
 0x967   : > { %v1463_v16 = vadd.f32 %v2644_v49, %v1462_v15 }
 0x969   : > { %v1471_v17 = vmul.f32 0.044715, %v1463_v16  ;;  %v1468_v8 = vmul.f32 0.5, %v1463_v16 }
 0x96b   : > { %v1474_v18 = vmul.f32 %v1471_v17, %v1463_v16 }
 0x96d   : > { %v1477_v20 = vmul.f32 %v1474_v18, %v1463_v16 }
 0x96e   : > { %v1464_v21 = vpop.f32.mrf.mxu1 }
 0x96f   : > { %v1480_v22 = vadd.f32 %v1477_v20, %v1463_v16 }
 0x971   : > { %v1483_v10 = vmul.f32 0.7978846, %v1480_v22  ;;  %v3503_v22 = vpop.permute.xlu1 %1704 }
 0x973   : > { %2715 = vtanh.f32 %v1483_v10 }
 0x979   : > { %v2716_v24 = vpop.eup %2715 }
 0x97a   : > { %v1489_v19 = vadd.f32 1.0, %v2716_v24 }
 0x97c   : > { %v1492_v25 = vmul.f32 %v1489_v19, %v1468_v8 }
 0x97e   : > { %v1494_v26 = vpack.c.bf16 %v1492_v25, %v1492_v25 }
 0x980   : > { %1576 = vmatmul.bf16.gmra.mxu3 %v1494_v26 }
 0x998   : > { %v1572_v28 = vpop.f32.mrf.mxu3 }
 0x999   : > { %v1573_v29 = vadd.f32 %v2645_v27, %v1572_v28 }
 0x99b   : > { %v1581_v30 = vadd.f32 %v1573_v29, %v3385_v32 }
 0x99d   : > { %v1586_v31 = vsel %vm655_vm0, %v1581_v30, 0.0 }
 0x99e   : > { %1587 = vadd.xlane.f32.xlu2 %v1586_v31 }
 0x9a0   : > { %v1574_v11 = vpop.f32.mrf.mxu3 }
 0x9a1   : > { %v1575_v33 = vadd.f32 %v2645_v27, %v1574_v11 }
 0x9a3   : > { %v1582_v34 = vadd.f32 %v1575_v33, %v3390_v35  ;;  %v3464_v35 = vpop.permute.xlu2 %1781 }
 0x9a5   : > { %v1589_v36 = vsel %vm655_vm0, %v1582_v34, 0.0 }
 0x9a6   : > { %1590 = vadd.xlane.f32.xlu0 %v1589_v36  ;;  %v2646_v36 = vld [vmem:[%s3669_s12] ss:$0 sm:$0xff] }
 0x9b6   : > { %1797 = vperm.xlu2 %2624, %v1678_v42  }
 0x9be   : > { %2626 = vset.pattern.permute.xlu2 %v2976_v43 }
 0x9bf   : > { %1809 = vperm.xlu2 %2626, %v1678_v42  }
 0x9c7   : > { %2628 = vset.pattern.permute.xlu2 %v2978_v44 }
 0x9c8   : > { %1708 = vperm.xlu2 %2628, %v1678_v42  }
 0x9d0   : > { %2631 = vset.pattern.permute.xlu2 %v2979_v50 }
 0xa03   : > { %v1577_v38 = vpop.f32.mrf.mxu3 }
 0xa04   : > { %v1578_v39 = vadd.f32 %v2645_v27, %v1577_v38  ;;  %v3507_v27 = vpop.permute.xlu1 %1726 }
 0xa06   : > { %v1583_v0 = vadd.f32 %v1578_v39, %v3396_v40 }
 0xa08   : > { %v1592_v41 = vsel %vm655_vm0, %v1583_v0, 0.0 }
 0xa09   : > { %1593 = vadd.xlane.f32.xlu0 %v1592_v41  ;;  %v2487_v41 = vld [vmem:[#allocation8 + $0x80] sm:$0xff] }
 0xa0b   : > { %v1579_v32 = vpop.f32.mrf.mxu3 }
 0xa0c   : > { %v2647_v32 = vld [vmem:[%s3670_s13] ss:$0 sm:$0xff] }
 0xa11   : > { %v1588_v40 = vpop.xlane.xlu2 %1587 }
 0xa12   : > { %v1595_v45 = vmul.f32 %v1588_v40, %v3192_v12 }
 0xa14   : > { %v3469_v47 = vsub.f32 %v1581_v30, %v1595_v45 }
 0xa16   : > { %v1601_v1 = vmul.f32 %v3469_v47, %v3469_v47 }
 0xa18   : > { %v1604_v52 = vsel %vm655_vm0, %v1601_v1, 0.0 }
 0xa19   : > { %v1591_v48 = vpop.xlane.xlu0 %1590  ;;  %v3497_v23 = vpop.permute.xlu2 %1797 }
 0xa1a   : > { %v1596_v49 = vmul.f32 %v1591_v48, %v3192_v12 }
 0xa1c   : > { %v3475_v51 = vsub.f32 %v1582_v34, %v1596_v49  ;;  %v2488_v34 = vld [vmem:[#allocation8 + $0x88] sm:$0xff] }
 0xa1d   : > { %1793 = vperm.xlu0 %2623, %v3451_v13   ;;  %2104 = vmatpush.bf16.msrb.mxu1 %v2488_v34 }
 0xa1e   : > { %v1602_v53 = vmul.f32 %v3475_v51, %v3475_v51 }
 0xa20   : > { %v1607_v54 = vsel %vm655_vm0, %v1602_v53, 0.0 }
 0xa21   : > { %v3501_v20 = vpop.permute.xlu2 %1809  ;;  %2105 = vmatpush.bf16.msrb.mxu1 %v2487_v41 }
 0xa25   : > { %2630 = vset.pattern.permute.xlu0 %v2977_v4 }
 0xa29   : > { %v3505_v25 = vpop.permute.xlu2 %1708 }
 0xa47   : > { %1605 = vadd.xlane.f32.xlu0 %v1604_v52 }
 0xa4f   : > { %1608 = vadd.xlane.f32.xlu0 %v1607_v54 }
 0xa63   : > { %1730 = vperm.xlu0 %2630, %v1678_v42  }
 0xa6b   : > { %2635 = vset.pattern.permute.xlu0 %v2981_v57 }
 0xa6c   : > { %1681 = vperm.xlu0 %2635, %v3451_v13  }
 0xa74   : > { %2637 = vset.pattern.permute.xlu0 %v2982_v58 }
 0xa75   : > { %1817 = vperm.xlu0 %2637, %v3451_v13  }
 0xa7c   : > { %v1594_v59 = vpop.xlane.xlu0 %1593 }
 0xa7d   : > { %v1597_v60 = vmul.f32 %v1594_v59, %v3192_v12 }
 0xa7f   : > { %v3484_v61 = vsub.f32 %v1583_v0, %v1597_v60  ;;  %v3515_v0 = vpop.permute.xlu1 %1744 }
 0xa81   : > { %v1603_v62 = vmul.f32 %v3484_v61, %v3484_v61 }
 0xa83   : > { %v1610_v2 = vsel %vm655_vm0, %v1603_v62, 0.0 }
 0xa84   : > { %1611 = vadd.xlane.f32.xlu2 %v1610_v2 }
 0xa8f   : > { %v3491_v3 = vpop.permute.xlu0 %1793 }
 0xa9c   : > { %1740 = vperm.xlu2 %2631, %v3451_v13  }
 0xaa4   : > { %2633 = vset.pattern.permute.xlu2 %v2980_v56 }
 0xaa5   : > { %1752 = vperm.xlu2 %2633, %v3451_v13  }
 0xaad   : > { %2636 = vset.pattern.permute.xlu2 %v2981_v57 }
 0xaae   : > { %1686 = vperm.xlu2 %2636, %v1678_v42  }
 0xab6   : > { %2638 = vset.pattern.permute.xlu2 %v2982_v58 }
 0xab7   : > { %1821 = vperm.xlu2 %2638, %v1678_v42  }
 0xaba   : > { %v1606_v63 = vpop.xlane.xlu0 %1605 }
 0xabb   : > { %v1613_v6 = vmul.f32 %v1606_v63, %v3192_v12 }
 0xabd   : > { %v1616_v46 = vadd.f32 1e-06, %v1613_v6 }
 0xabf   : > { %vm1625_vm15 = vweird.f32 %v1616_v46 }
 0xac2   : > { %v1609_v55 = vpop.xlane.xlu0 %1608 }
 0xac3   : > { %v1614_v5 = vmul.f32 %v1609_v55, %v3192_v12 }
 0xac5   : > { %v1617_v9 = vadd.f32 1e-06, %v1614_v5 }
 0xac7   : > { %2717 = vrsqrt.f32 %v1617_v9  ;;  %vm1635_vm13 = vweird.f32 %v1617_v9 }
 0xac8   : > { %2719 = vrsqrt.f32 %v1616_v46 }
 0xacd   : > { %v2718_v13 = vpop.eup %2717 }
 0xace   : > { %v2720_v15 = vpop.eup %2719  ;;  %v1630_v16 = vmul.f32 %v2718_v13, %v1617_v9  ;;  %vm1636_vm10 = vweird.f32 %v2718_v13 }
 0xacf   : > { %v1620_v17 = vmul.f32 %v2720_v15, %v1616_v46  ;;  %vm1626_vm11 = vweird.f32 %v2720_v15  ;;  %vm1637_vm14 = vmor %vm1635_vm13, %vm1636_vm10  ;;  %vm1778_vm10 = vcmask 1046528   ;;  %vm1907_vm13 = vcmask 785408  }
 0xad0   : > { %v1631_v18 = vmul.f32 %v2718_v13, %v1630_v16  ;;  %vm1627_vm1 = vmor %vm1625_vm15, %vm1626_vm11  ;;  %vm1862_vm11 = vsmask.f32 7424 }
 0xad1   : > { %v1621_v21 = vmul.f32 %v2720_v15, %v1620_v17 }
 0xad2   : > { %v1632_v10 = vmul.f32 0.5, %v1631_v18 }
 0xad3   : > { %v1622_v24 = vmul.f32 0.5, %v1621_v21 }
 0xad4   : > { %v1633_v8 = vsub.f32 1.5, %v1632_v10 }
 0xad5   : > { %v1623_v19 = vsub.f32 1.5, %v1622_v24 }
 0xad6   : > { %v1634_v26 = vmul.f32 %v2718_v13, %v1633_v8 }
 0xad7   : > { %v1624_v28 = vmul.f32 %v2720_v15, %v1623_v19 }
 0xad8   : > { %v1638_v29 = vsel %vm1637_vm14, %v2718_v13, %v1634_v26 }
 0xad9   : > { %v1628_v30 = vsel %vm1627_vm1, %v2720_v15, %v1624_v28  ;;  %v1650_v31 = vmul.f32 %v1638_v29, %v3475_v51 }
 0xada   : > { %v1649_v37 = vmul.f32 %v1628_v30, %v3469_v47  ;;  %v1756_v47 = vpop.permute.xlu1 %1755 }
 0xadb   : > { %v1656_v39 = vmul.f32 %v2646_v36, %v1650_v31  ;;  %v1758_v50 = vrot.slane %v1756_v47, 7 }
 0xadc   : > { %v1655_v42 = vmul.f32 %v2646_v36, %v1649_v37 }
 0xadd   : > { %v3520_v43 = vadd.f32 %v2647_v32, %v1656_v39 }
 0xade   : > { %v3524_v40 = vadd.f32 %v2647_v32, %v1655_v42 }
 0xadf   : > { %v1666_v48 = vrot.slane %v3520_v43, 4  ;;  %v1771_v56 = vrot.slane %v3520_v43, 2  ;;  %v1694_v6 = vrot.slane %v3520_v43, 5  ;;  %v1716_v9 = vrot.slane %v3520_v43, 6 }
 0xae0   : > { %v1671_v1 = vrot.slane %v3524_v40, 4  ;;  %v1770_v59 = vrot.slane %v3524_v40, 2  ;;  %v1698_v13 = vrot.slane %v3524_v40, 5 }
 0xae2   : > { %v1672_v54 = vsel %vm896_vm12, %v1671_v1, %v1666_v48  ;;  %v1772_v5 = vsel %vm1769_vm3, %v1770_v59, %v1771_v56  ;;  %v3545_v19 = vsel %vm1693_vm6, %v1698_v13, %v1694_v6 }
 0xae3   : > { %v1800_v2 = vmul.f32 %v3491_v3, %v1672_v54  ;;  %v1720_v3 = vrot.slane %v3524_v40, 6  ;;  %v1788_v21 = vmul.f32 %v3464_v35, %v1772_v5 }
 0xae5   : > { %v1802_v24 = vpack.c.bf16 %v1800_v2, %v1800_v2  ;;  %v1721_v26 = vsel %vm1715_vm8, %v1720_v3, %v1716_v9 }
 0xae7   : > { %v1884_v34 = vunpack.c.l.b16 %v1802_v24 }
 0xaf7   : > { %v1612_v11 = vpop.xlane.xlu2 %1611 }
 0xaf8   : > { %v1615_v33 = vmul.f32 %v1612_v11, %v3192_v12  ;;  %v1731_v12 = vpop.permute.xlu0 %1730 }
 0xaf9   : > { %v3554_v35 = vmul.f32 %v1731_v12, %v1721_v26 }
 0xafa   : > { %v1618_v38 = vadd.f32 1e-06, %v1615_v33  ;;  %v1790_v33 = vpack.c.bf16 %v1788_v21, %v1788_v21 }
 0xafc   : > { %2721 = vrsqrt.f32 %v1618_v38  ;;  %vm1645_vm5 = vweird.f32 %v1618_v38 }
 0xaff   : > { %v3522_v4 = vpop.permute.xlu2 %1740 }
 0xb00   : > { %v3528_v51 = vpop.permute.xlu0 %1681 }
 0xb02   : > { %v2722_v44 = vpop.eup %2721 }
 0xb03   : > { %v1640_v45 = vmul.f32 %v2722_v44, %v1618_v38  ;;  %vm1646_vm4 = vweird.f32 %v2722_v44 }
 0xb04   : > { %vm1647_vm7 = vmor %vm1645_vm5, %vm1646_vm4 }
 0xb05   : > { %v1641_v49 = vmul.f32 %v2722_v44, %v1640_v45 }
 0xb07   : > { %v1642_v52 = vmul.f32 0.5, %v1641_v49  ;;  %v1753_v53 = vpop.permute.xlu2 %1752 }
 0xb08   : > { %v1757_v57 = vrot.slane %v1753_v53, 7  ;;  %v1818_v30 = vpop.permute.xlu0 %1817 }
 0xb09   : > { %v1643_v58 = vsub.f32 1.5, %v1642_v52  ;;  %v1824_v37 = vmul.f32 %v1818_v30, %v1721_v26 }
 0xb0a   : > { %v1759_v60 = vsel %vm1737_vm2, %v1757_v57, %v1758_v50  ;;  %v1763_v62 = vmul.f32 %v1757_v57, %v3524_v40 }
 0xb0b   : > { %v1644_v63 = vmul.f32 %v2722_v44, %v1643_v58  ;;  %v1764_v55 = vmul.f32 %v1759_v60, %v3520_v43  ;;  %v1826_v60 = vpack.c.bf16 %v1824_v37, %v1824_v37 }
 0xb0c   : > { %v1766_v46 = vpack.c.bf16 %v1763_v62, %v1763_v62 }
 0xb0d   : > { %v1648_v15 = vsel %vm1647_vm7, %v2722_v44, %v1644_v63  ;;  %v1767_v16 = vpack.c.bf16 %v1764_v55, %v1764_v55 }
 0xb0e   : > { %v1651_v17 = vmul.f32 %v1648_v15, %v3484_v61  ;;  %v1857_v18 = vunpack.c.l.b16 %v1766_v46  ;;  %v3552_v61 = vmul.f32 %v3499_v14, %v3545_v19  ;;  %v1877_v14 = vunpack.c.l.b16 %v1790_v33 }
 0xb0f   : > { %v1858_v10 = vunpack.c.l.b16 %v1767_v16  ;;  %v1687_v8 = vpop.permute.xlu2 %1686 }
 0xb10   : > { %v1657_v28 = vmul.f32 %v2646_v36, %v1651_v17  ;;  %v1690_v29 = vmul.f32 %v1687_v8, %v1672_v54  ;;  %v1898_v17 = vunpack.c.l.b16 %v1826_v60  ;;  %v2475_v60 = vld [vmem:[#allocation8 + $0x20] sm:$0xff] }
 0xb11   : > { %v1860_v31 = vpack.c.b16 %v1858_v10, %v1857_v18 }
 0xb12   : > { %v3548_v11 = vadd.f32 %v2647_v32, %v1657_v28  ;;  %v1692_v36 = vpack.c.bf16 %v1690_v29, %v1690_v29 }
 0xb13   : > { %v1866_v45 = vshll.u32 %v1860_v31, 16 }
 0xb14   : > { %v1765_v38 = vmul.f32 %v1758_v50, %v3548_v11  ;;  %v1667_v39 = vrot.slane %v3548_v11, 4  ;;  %v1717_v41 = vrot.slane %v3548_v11, 6  ;;  %v1773_v32 = vrot.slane %v3548_v11, 2 }
 0xb15   : > { %v1695_v12 = vrot.slane %v3548_v11, 5  ;;  %v3566_v62 = vunpack.c.l.b16 %v1692_v36 }
 0xb16   : > { %v1768_v42 = vpack.c.bf16 %v1765_v38, %v1765_v38  ;;  %v1668_v44 = vsel %vm896_vm12, %v1666_v48, %v1667_v39  ;;  %v1718_v49 = vsel %vm1715_vm8, %v1716_v9, %v1717_v41  ;;  %v1774_v52 = vsel %vm1769_vm3, %v1771_v56, %v1773_v32 }
 0xb17   : > { %v1676_v47 = vsel %vm1675_vm9, %v1668_v44, %v1671_v1  ;;  %v1822_v50 = vpop.permute.xlu2 %1821  ;;  %v1724_v57 = vsel %vm1693_vm6, %v1718_v49, %v1720_v3  ;;  %v1779_v58 = vsel %vm1778_vm10, %v1774_v52, %v1770_v59  ;;  %v1696_v5 = vsel %vm1693_vm6, %v1694_v6, %v1695_v12  ;;  %v2484_v52 = vld [vmem:[#allocation8 + $0x68] sm:$0xff] }
 0xb18   : > { %v1859_v53 = vunpack.c.l.b16 %v1768_v42  ;;  %v1689_v54 = vmul.f32 %v3528_v51, %v1676_v47  ;;  %v1825_v48 = vmul.f32 %v1822_v50, %v1724_v57  ;;  %v1789_v2 = vmul.f32 %v3495_v7, %v1779_v58  ;;  %v2485_v50 = vld [vmem:[#allocation8 + $0x70] sm:$0xff]  ;;  %v2480_v58 = vld [vmem:[#allocation8 + $0x48] sm:$0xff] }
 0xb19   : > { %v1801_v1 = vmul.f32 %v3497_v23, %v1676_v47  ;;  %v1868_v9 = vrot.slane %v1866_v45, 1  ;;  %v1733_v56 = vmul.f32 %v3507_v27, %v1724_v57  ;;  %v1702_v3 = vsel %vm896_vm12, %v1696_v5, %v1698_v13  ;;  %v2476_v57 = vld [vmem:[#allocation8 + $0x28] sm:$0xff] }
 0xb1a   : > { %v1861_v63 = vpack.c.b16 %v1859_v53, %v1859_v53  ;;  %v1691_v55 = vpack.c.bf16 %v1689_v54, %v1689_v54  ;;  %v1827_v46 = vpack.c.bf16 %v1825_v48, %v1825_v48  ;;  %v1791_v51 = vpack.c.bf16 %v1789_v2, %v1789_v2  ;;  %v2483_v53 = vld [vmem:[#allocation8 + $0x60] sm:$0xff]  ;;  %v2477_v54 = vld [vmem:[#allocation8 + $0x30] sm:$0xff]  ;;  %v2474_v2 = vld [vmem:[#allocation8 + $0x18] sm:$0xff] }
 0xb1b   : > { %v1803_v59 = vpack.c.bf16 %v1801_v1, %v1801_v1  ;;  %v1813_v21 = vmul.f32 %v3501_v20, %v1702_v3  ;;  %v1864_v23 = vshrl.u32 %v1860_v31, 16  ;;  %v1735_v28 = vpack.c.bf16 %v1733_v56, %v1733_v56  ;;  %v2479_v48 = vld [vmem:[#allocation8 + $0x40] sm:$0xff] }
 0xb1c   : > { %v1871_v15 = vshll.u32 %v1861_v63, 16  ;;  %v3572_v16 = vunpack.c.l.b16 %v1691_v55  ;;  %v1899_v18 = vunpack.c.l.b16 %v1827_v46  ;;  %v1878_v7 = vunpack.c.l.b16 %v1791_v51  ;;  %v2473_v63 = vld [vmem:[#allocation8 + $0x10] sm:$0xff]  ;;  %v2472_v55 = vld [vmem:[#allocation8 + $0x8] sm:$0xff]  ;;  %v2471_v1 = vld [vmem:[#allocation8] sm:$0xff] }
 0xb1d   : > { %v1885_v24 = vunpack.c.l.b16 %v1803_v59  ;;  %v1815_v26 = vpack.c.bf16 %v1813_v21, %v1813_v21  ;;  %v1869_v30 = vor.u32 %v1868_v9, %v1864_v23  ;;  %v1814_v13 = vpack.c.bf16 %v3552_v61, %v3552_v61 }
 0xb1e   : > { %v1873_v10 = vrot.slane %v1871_v15, 1  ;;  %v1832_v6 = vpack.c.b16 %v3566_v62, %v3572_v16  ;;  %v1900_v27 = vpack.c.b16 %v1899_v18, %v1898_v17  ;;  %v1879_v8 = vpack.c.b16 %v1878_v7, %v1877_v14 }
 0xb1f   : > { %v1886_v29 = vpack.c.b16 %v1885_v24, %v1884_v34  ;;  %v1736_v20 = vpack.c.bf16 %v3554_v35, %v3554_v35  ;;  %v1892_v33 = vunpack.c.l.b16 %v1815_v26  ;;  %v1711_v37 = vmul.f32 %v3503_v22, %v1702_v3 }
 0xb20   : > { %1880 = vrot.lane.b32.xlu1 %v1879_v8, %s2983_s23  ;;  %2451 = vmatmul.msk.bf16.vlgmr.msrb.gmra.mxu1 %vm655_vm0, %v1900_v27  ;;  %v1874_v31 = vsel %vm1862_vm11, %v1869_v30, %v1873_v10  ;;  %v1842_v38 = vunpack.c.l.b16 %v1735_v28  ;;  %v1891_v39 = vunpack.c.l.b16 %v1814_v13  ;;  %v1712_v34 = vmul.f32 %v3505_v25, %v3545_v19  ;;  %v2648_v10 = vld [vmem:[%s3711_s18] ss:$0 sm:$0xff]  ;;  %s2863_s18 = scalar_lea.hbm %s3712_s24, 32 }
 0xb21   : > { %1887 = vrot.lane.b32.xlu2 %v1886_v29, %s2962_s19  ;;  %v1843_v36 = vunpack.c.l.b16 %v1736_v20  ;;  %v1713_v41 = vpack.c.bf16 %v1711_v37, %v1711_v37  ;;  %v1738_v32 = vsel %vm1737_vm2, %v3548_v11, %v3524_v40  ;;  %v1748_v25 = vmul.f32 %v3515_v0, %v3520_v43  ;;  %v2486_v11 = vld [vmem:[#allocation8 + $0x78] sm:$0xff]  ;;  %v2481_v43 = vld [vmem:[#allocation8 + $0x50] sm:$0xff] }
 0xb22   : > { %v1893_v61 = vpack.c.b16 %v1892_v33, %v1891_v39  ;;  %v1714_v35 = vpack.c.bf16 %v1712_v34, %v1712_v34  ;;  %v1747_v22 = vmul.f32 %v3522_v4, %v1738_v32  ;;  %2084 = vmatpush.bf16.msrb.mxu2 %v2486_v11  ;;  %v2478_v4 = vld [vmem:[#allocation8 + $0x38] sm:$0xff]  ;;  %vm1904_vm12 = vcmask 523264  }
 0xb23   : > { %v1844_v42 = vpack.c.b16 %v1843_v36, %v1842_v38  ;;  %v1835_v44 = vunpack.c.l.b16 %v1713_v41  ;;  %v1750_v45 = vpack.c.bf16 %v1748_v25, %v1748_v25  ;;  %2070 = vmatpush.bf16.msrb.mxu0 %v2478_v4  ;;  %v2482_v0 = vld [vmem:[#allocation8 + $0x58] sm:$0xff] }
 0xb24   : > { %v1836_v14 = vunpack.c.l.b16 %v1714_v35  ;;  %v1749_v19 = vpack.c.bf16 %v1747_v22, %v1747_v22 }
 0xb25   : > { %v1850_v49 = vunpack.c.l.b16 %v1750_v45 }
 0xb26   : > { %v1837_v12 = vpack.c.b16 %v1836_v14, %v1835_v44  ;;  %v1849_v47 = vunpack.c.l.b16 %v1749_v19  ;;  %2085 = vmatpush.bf16.msrb.mxu2 %v2485_v50 }
 0xb27   : > { %2071 = vmatpush.bf16.msrb.mxu0 %v2477_v54 }
 0xb28   : > { %1894 = vrot.lane.b32.xlu1 %v1893_v61, %s2960_s1  ;;  %v1851_v40 = vpack.c.b16 %v1850_v49, %v1849_v47 }
 0xb29   : > { %1845 = vrot.lane.b32.xlu2 %v1844_v42, %s2962_s19 }
 0xb2a   : > { %2086 = vmatpush.bf16.msrb.mxu2 %v2484_v52 }
 0xb2b   : > { %2072 = vmatpush.bf16.msrb.mxu0 %v2476_v57 }
 0xb2e   : > { %2087 = vmatpush.bf16.msrb.mxu2 %v2483_v53 }
 0xb2f   : > { %2073 = vmatpush.bf16.msrb.mxu0 %v2475_v60 }
 0xb30   : > { %1838 = vrot.lane.b32.xlu1 %v1837_v12, %s2983_s23  ;;  %s2857_s23 = sshra.s32 %s2143_s20, 4  ;;  %s2858_s23 = int_to_ptr.hbm [resolvable:$true] %s2857_s23 }
 0xb31   : > { %p2864_p3 = scmp.lt.s32.totalorder %s2858_s23, %s3712_s24 }
 0xb32   : > { %2088 = vmatpush.bf16.msrb.mxu2 %v2482_v0 }
 0xb33   : > { %2074 = vmatpush.bf16.msrb.mxu0 %v2474_v2 }
 0xb36   : > { %2089 = vmatpush.bf16.msrb.mxu2 %v2481_v43 }
 0xb37   : > { %2075 = vmatpush.bf16.msrb.mxu0 %v2473_v63 }
 0xb38   : > { %1852 = vrot.lane.b32.xlu1 %v1851_v40, %s2960_s1  ;;  %s3710_s1 = sld [smem:[#allocation19_spill]] }
 0xb3a   : > { %2090 = vmatpush.bf16.msrb.mxu2 %v2480_v58 }
 0xb3b   : > { %2076 = vmatpush.bf16.msrb.mxu0 %v2472_v55 }
 0xb3e   : > { %2091 = vmatpush.bf16.msrb.mxu2 %v2479_v48  ;;  %s3605_s16 = sand.u32 1, %s3710_s1   ;;  %s2859_s1 = scalar_lea.hbm %s2858_s23, 16 }
 0xb3f   : > { %2077 = vmatpush.bf16.msrb.mxu0 %v2471_v1  ;;  %s2299_s17 = sshll.u32 %s3605_s16, 4  ;;  %s2124_s29 = scalar_lea.sflag [#allocation4], %s3605_s16 }
 0xb40   : > { %s637_s28 = scalar_lea.vmem [#allocation10], %s2299_s17  ;;  %p2860_p0 = scmp.ne.s32.totalorder %s2858_s23, %s2859_s1 }
 0xb41   : > { %s2140_s25 = sshll.u32 %s637_s28, 4  ;;  %p2865_p4 = scmp.lt.s32.totalorder %s2863_s18, %s2859_s1  ;;  %s2141_s25 = int_to_ptr.vmem [resolvable:$true] %s2140_s25 }
 0xb42   : > { %p2861_p1 = pnand %p2860_p0, %p3118_p5 }
 0xb43   : > { %p2866_p7 = por %p2865_p4, %p2864_p3 }
 0xb44   : > { %p2862_p2 = pneg %p2861_p1 }
 0xb46   : > { %p2867_p8 = pnand %p2866_p7, %p2862_p2 }
 0xb7b   : > { %v1888_v56 = vpop.permute.xlu2 %1887 }
 0xb83   : > { %v1846_v17 = vpop.permute.xlu2 %1845 }
 0xb92   : > { %v1881_v5 = vpop.permute.xlu1 %1880 }
 0xb93   : > { %v1913_v9 = vsel %vm655_vm0, %v1874_v31, %v1881_v5 }
 0xb94   : > { %v1915_v51 = vsel %vm1904_vm12, %v1913_v9, %v1888_v56 }
 0xb9a   : > { %v1895_v46 = vpop.permute.xlu1 %1894 }
 0xb9b   : > { %v1917_v15 = vsel %vm1907_vm13, %v1915_v51, %v1895_v46 }
 0xb9c   : > { %2092 = vmatmul.bf16.vlgmr.msrb.gmra.mxu2 %v1917_v15 }
 0xb9d   : > { %v2107_v8 = vpop.f32.mrf.mxu1 }
 0xba2   : > { %v1839_v59 = vpop.permute.xlu1 %1838 }
 0xba3   : > { %v1903_v3 = vsel %vm655_vm0, %v1832_v6, %v1839_v59 }
 0xba4   : > { %v1906_v7 = vsel %vm1904_vm12, %v1903_v3, %v1846_v17 }
 0xba5   : > { %v2109_v30 = vpop.f32.mrf.mxu1 }
 0xbaa   : > { %v1853_v18 = vpop.permute.xlu1 %1852 }
 0xbab   : > { %v1909_v21 = vsel %vm1907_vm13, %v1906_v7, %v1853_v18 }
 0xbac   : > { %2078 = vmatmul.bf16.vlgmr.msrb.gmra.mxu0 %v1909_v21 }
 0xc1f   : > { %v2093_v23 = vpop.f32.mrf.mxu2 }
 0xc27   : > { %v2095_v28 = vpop.f32.mrf.mxu2 }
 0xc29   : > { %v2079_v24 = vpop.f32.mrf.mxu0 }
 0xc2a   : > { %v2080_v27 = vadd.f32 %v2648_v10, %v2079_v24 }
 0xc2c   : > { %v2094_v62 = vadd.f32 %v2093_v23, %v2080_v27 }
 0xc2e   : > { %v2108_v16 = vadd.f32 %v2107_v8, %v2094_v62 }
 0xc30   : > { %2112 = vst [vmem:[%s637_s28] sm:$0xff] %v2108_v16 }
 0xc31   : > { %v2081_v6 = vpop.f32.mrf.mxu0 }
 0xc32   : > { %v2082_v26 = vadd.f32 %v2648_v10, %v2081_v6 }
 0xc34   : > { %v2096_v29 = vadd.f32 %v2095_v28, %v2082_v26 }
 0xc36   : > { %v2110_v13 = vadd.f32 %v2109_v30, %v2096_v29 }
 0xc38   : > { %2113 = vst [vmem:[%s637_s28 + $0x8] sm:$0xff] %v2110_v13  ;;  %v2114_v20 = vadd.f32 %v2110_v13, %v2108_v16 }
 0xc39   : > { %2870 = shalt.err (!%p2867_p8)
}
 0xc3a   : > { %s2984_s28 = smov 128   ;;  %v2115_v31 = vrot.slane %v2114_v20, 4  ;;  %s3714_s21 = sld [smem:[#allocation32_spill]] }
 0xc3b   : > { %2507 = dma.vmem_to_hbm [thread:$0]  (%p3118_p5), %s2141_s25, 256, %s2143_s20, %s2124_s29, %s2984_s28, %s2984_s28, %s2971_s2  }
 0xc3c   : > { %v2116_v33 = vadd.f32 %v2115_v31, %v2114_v20  ;;  %s643_s1 = scalar_lea.vmem [#allocation11], %s3605_s16  ;;  %s2129_s18 = scalar_lea.sflag [#allocation12], %s3605_s16 }
 0xc3d   : > { %s2156_s19 = sshll.u32 %s643_s1, 4  ;;  %s2157_s19 = int_to_ptr.vmem [resolvable:$true] %s2156_s19 }
 0xc3e   : > { %v2117_v37 = vrot.slane %v2116_v33, 2 }
 0xc40   : > { %v2118_v38 = vadd.f32 %v2117_v37, %v2116_v33  ;;  %s2154_s23 = scalar_lea.hbm %s3714_s21, %s3101_s0  ;;  %s2891_s0 = scalar_lea.hbm %s3714_s21, 2 }
 0xc41   : > { %s2158_s8 = sshll.u32 %s2154_s23, 4  ;;  %s2159_s8 = int_to_ptr.hbm [resolvable:$true] %s2158_s8 }
 0xc42   : > { %v2119_v39 = vrot.slane %v2118_v38, 1  ;;  %s2885_s2 = sshra.s32 %s2159_s8, 4  ;;  %s2886_s2 = int_to_ptr.hbm [resolvable:$true] %s2885_s2 }
 0xc43   : > { %s2887_s25 = scalar_lea.hbm %s2886_s2, 1  ;;  %p2892_p12 = scmp.lt.s32.totalorder %s2886_s2, %s3714_s21 }
 0xc44   : > { %v2120_v34 = vadd.f32 %v2119_v39, %v2118_v38  ;;  %p2888_p9 = scmp.ne.s32.totalorder %s2886_s2, %s2887_s25  ;;  %p2893_p13 = scmp.lt.s32.totalorder %s2891_s0, %s2887_s25 }
 0xc46   : > { %v2121_v36 = vmul.f32 0.0625, %v2120_v34  ;;  %p2889_p10 = pnand %p2888_p9, %p3118_p5  ;;  %p2894_p0 = por %p2893_p13, %p2892_p12 }
 0xc48   : > { %2122 = vst [vmem:[%s643_s1] sm:$0x1] %v2121_v36  ;;  %p2890_p11 = pneg %p2889_p10 }
 0xc4a   : > { %p2895_p1 = pnand %p2894_p0, %p2890_p11 }
 0xc4c   : > { %2898 = shalt.err (!%p2895_p1)
}
 0xc4d   : > { %2508 = dma.vmem_to_hbm [thread:$0]  (%p3118_p5), %s2157_s19, 16, %s2159_s8, %s2129_s18  }
 0xc4e PF: > { %s3715_s16 = sld [smem:[#allocation21_spill]] }
 0xc4f   : > { %s3716_s28 = sld [smem:[#allocation18_spill]] }
 0xc54   : > { %p2539_p2 = scmp.ge.s32.totalorder %s3715_s16, 2 }
 0xc55   : > { %s2170_s22 = sand.u32 1, %s3716_s28  }
 0xc56   : > { %p2525_p3 = pnand %p2539_p2, %p3122_p6  ;;  %s2171_s23 = scalar_lea.sflag [#allocation4], %s2170_s22 }
 0xc58   : > { %p2526_p4 = pneg %p2525_p3 }
 0xc5a   : > { %2928 = dma.done.wait (%p2526_p4), %s2171_s23, 256  }
 0xc5b   : > { %2930 = vsyncadd (%p2526_p4), %s2171_s23, 4294967040  ;;  %s2181_s1 = scalar_lea.sflag [#allocation12], %s2170_s22 }
 0xc5c   : > { %2932 = dma.done.wait (%p2526_p4), %s2181_s1, 16  }
 0xc5d   : > { %2934 = vsyncadd (%p2526_p4), %s2181_s1, 4294967280  ;;  %s3718_s30 = sld [smem:[#allocation22_spill]] }
 0xc5e   : > { %s3719_s27 = sld [smem:[#allocation19_spill]] }
 0xc5f   : > { %s3720_s28 = sld [smem:[#allocation20_spill]] }
 0xc60   : > { %s3721_s29 = sld [smem:[#allocation23_spill]] }
 0xc63   : > { %p35_p5 = scmp.ge.s32.totalorder %s3718_s30, 4  }
 0xc65   :  { %37 = sbr.rel (!%p35_p5) target bundleno = 16 (0x10), region = 157 }
 0xc6a   :  { %2186 = vsyncpa [#allocation3], 1 }
 0xc6b   :  { %2188 = vsyncpa [#allocation3 + $0x1], 1 }
 0xc6c   :  { %2189 = vsyncpa [#allocation6], 1 }
 0xc6d   :  { %2190 = vsyncpa [#allocation9], 1 }
 0xc6e   :  { %2191 = vsyncpa [#allocation4], 1 }
 0xc6f   :  { %2193 = vsyncpa [#allocation4 + $0x1], 1 }
 0xc70   :  { %2194 = vsyncpa [#allocation12], 1 }
 0xc71   :  { %2196 = vsyncpa [#allocation12 + $0x1], 1 }

</bundles_post_ra>
